<compile_context>
chip_gen: v5e
topology: v5e:2x2
jax: 0.10.0
libtpu: 0.0.40
codegen_flags: <defaults>
</compile_context>

<pallas_src>
import jax
import jax.numpy as jnp
from jax.experimental import pallas as pl
from jax.experimental.pallas import tpu as pltpu

SEQUENCE_LENGTH = 28   # matches the PyTorch module's hard-coded sequence_length
LANE = 128             # TPU lane width (output classes padded to this)
SUBLANE = 8            # f32 sublane count (batch padded to a multiple of this)

# v6e/v7x knob: bf16 MXU operands + f32 accumulation shortens the serial
# h @ W_hh -> tanh chain.  Default False for exact f32 parity with the
# PyTorch-style f32 reference (tolerance is loosened automatically if True).
USE_BF16_MXU_OPERANDS = False
MM_DTYPE = jnp.bfloat16 if USE_BF16_MXU_OPERANDS else jnp.float32


# ---------------------------------------------------------------------------
# Fused Pallas kernel: num_layers x (tanh RNN layer) + Linear over (B, T*H)
# ---------------------------------------------------------------------------
def _make_fused_rnn_fc_kernel(num_layers: int, seq_len: int):
    """Ref order: x, (w_ih_T, w_hh_T, b) * L, fc_wT, fc_b, out, hs_scratch."""

    def kernel(x_ref, *refs):
        layer_refs = refs[: 3 * num_layers]
        fc_wT_ref = refs[3 * num_layers]        # (T, H, Cpad) == fc_w.T reshaped+padded
        fc_b_ref = refs[3 * num_layers + 1]     # (1, Cpad)
        out_ref = refs[3 * num_layers + 2]      # (Bp, Cpad)
        hs_ref = refs[3 * num_layers + 3]       # VMEM scratch (T*Bp, H)

        rows = x_ref.shape[0]                   # T * Bp (time-major)
        bp = rows // seq_len
        cpad = out_ref.shape[1]

        # Layer input for the current layer, a contiguous (T*Bp, D) slab.
        cur = x_ref[...]

        for layer in range(num_layers):
            w_ih_T = layer_refs[3 * layer][...]      # (D_in, H)   (MM_DTYPE)
            w_hh_T = layer_refs[3 * layer + 1][...]  # (H, H)      (MM_DTYPE)
            b = layer_refs[3 * layer + 2][...]       # (1, H) = b_ih + b_hh, f32
            H = w_hh_T.shape[0]
            last = layer == num_layers - 1

            # ONE batched input projection for ALL timesteps.  Independent of
            # h, so it sits entirely off the serial recurrence critical path.
            proj = jnp.dot(cur.astype(MM_DTYPE), w_ih_T,
                           preferred_element_type=jnp.float32) + b   # (T*Bp, H)

            h = jnp.zeros((bp, H), jnp.float32)
            if last:
                fc_b = fc_b_ref[...]
                acc = jnp.zeros((bp, cpad), jnp.float32)
            for t in range(seq_len):  # fully unrolled: seq_len is compile-time const
                h = jnp.tanh(
                    proj[t * bp:(t + 1) * bp, :]
                    + jnp.dot(h.astype(MM_DTYPE), w_hh_T,
                              preferred_element_type=jnp.float32))
                if last:
                    # FC folded into the last layer's loop: free filler under
                    # the serial W_hh dependency chain.
                    acc = acc + jnp.dot(h.astype(MM_DTYPE), fc_wT_ref[t],
                                        preferred_element_type=jnp.float32)
                else:
                    # Feed the next layer via VMEM (keeps vreg live ranges
                    # bounded; stores are off the critical path).
                    hs_ref[pl.ds(t * bp, bp), :] = h
            if last:
                out_ref[...] = acc + fc_b             # single lane-dense store
            else:
                cur = hs_ref[...]                     # next layer's batched input

    return kernel


# ---------------------------------------------------------------------------
# Wrapper
# ---------------------------------------------------------------------------
def basic_rnn_forward(params, x):
    """x: (B, T, input_size) batch-first (like the PyTorch module); h_0 = zeros."""
    B, T, D = x.shape
    layers = params["layers"]
    num_layers = len(layers)
    H = layers[0]["w_hh_T"].shape[1]
    cpad = params["fc_b"].shape[1]
    classes = params["classes"]

    # Wrapper-side layout plumbing (free): pad batch to a sublane multiple and
    # present a time-major, contiguous (T*Bp, D) slab so every layer's input
    # projection is one clean batched matmul.
    bp = ((B + SUBLANE - 1) // SUBLANE) * SUBLANE
    xp = jnp.pad(x, ((0, bp - B), (0, 0), (0, 0)))          # (Bp, T, D)
    xp = jnp.transpose(xp, (1, 0, 2)).reshape(T * bp, D)    # (T*Bp, D) time-major

    inputs = [xp]
    for lp in layers:
        inputs += [lp["w_ih_T"], lp["w_hh_T"], lp["b"]]
    inputs += [params["fc_wT"], params["fc_b"]]

    vmem = pl.BlockSpec(memory_space=pltpu.MemorySpace.VMEM)
    out_padded = pl.pallas_call(
        _make_fused_rnn_fc_kernel(num_layers, T),
        out_shape=jax.ShapeDtypeStruct((bp, cpad), jnp.float32),
        in_specs=[vmem] * len(inputs),
        out_specs=vmem,
        scratch_shapes=[pltpu.VMEM((T * bp, H), jnp.float32)],
    )(*inputs)
    return out_padded[:B, :classes]


# ---------------------------------------------------------------------------
# Parameter init (PyTorch layout) + one-time packing for the kernel
# ---------------------------------------------------------------------------
def init_raw_params(key, input_size, hidden_size, num_layers, classes, seq_len):
    """PyTorch-layout params with U(-1/sqrt(fan), 1/sqrt(fan)) init."""
    raw = {"rnn": []}
    k_rnn = 1.0 / float(hidden_size) ** 0.5
    for layer in range(num_layers):
        d_in = input_size if layer == 0 else hidden_size
        key, k1, k2, k3, k4 = jax.random.split(key, 5)
        raw["rnn"].append({
            "w_ih": jax.random.uniform(k1, (hidden_size, d_in), jnp.float32, -k_rnn, k_rnn),
            "w_hh": jax.random.uniform(k2, (hidden_size, hidden_size), jnp.float32, -k_rnn, k_rnn),
            "b_ih": jax.random.uniform(k3, (hidden_size,), jnp.float32, -k_rnn, k_rnn),
            "b_hh": jax.random.uniform(k4, (hidden_size,), jnp.float32, -k_rnn, k_rnn),
        })
    fan_in = hidden_size * seq_len
    k_fc = 1.0 / float(fan_in) ** 0.5
    key, k1, k2 = jax.random.split(key, 3)
    raw["fc_w"] = jax.random.uniform(k1, (classes, fan_in), jnp.float32, -k_fc, k_fc)
    raw["fc_b"] = jax.random.uniform(k2, (classes,), jnp.float32, -k_fc, k_fc)
    return raw


def pack_params(raw, seq_len):
    """One-time packing: pre-transpose weights, pre-sum biases, reshape+pad FC.

    Matmul operands (weights) are cast to MM_DTYPE once here; biases and all
    elementwise/EUP math stay f32 (v5e has no bf16 VPU/EUP path).
    """
    layers = []
    for lp in raw["rnn"]:
        h = lp["w_hh"].shape[0]
        layers.append({
            "w_ih_T": jnp.asarray(lp["w_ih"].T, dtype=MM_DTYPE),
            "w_hh_T": jnp.asarray(lp["w_hh"].T, dtype=MM_DTYPE),
            "b": (lp["b_ih"] + lp["b_hh"]).reshape(1, h).astype(jnp.float32),
        })
    classes, fan_in = raw["fc_w"].shape
    hidden = fan_in // seq_len
    cpad = ((classes + LANE - 1) // LANE) * LANE
    # fc_w.T[t*H + h, c] -> fc_wT[t, h, c]: matches the batch_first (B, T*H)
    # flatten order of out.reshape(B, -1).
    fc_wT = raw["fc_w"].T.reshape(seq_len, hidden, classes)
    fc_wT = jnp.pad(fc_wT, ((0, 0), (0, 0), (0, cpad - classes))).astype(MM_DTYPE)
    fc_b = jnp.pad(raw["fc_b"], (0, cpad - classes)).reshape(1, cpad).astype(jnp.float32)
    return {"layers": layers, "fc_wT": fc_wT, "fc_b": fc_b, "classes": classes}


# ---------------------------------------------------------------------------
# Pure-JAX reference (PyTorch semantics) for validation
# ---------------------------------------------------------------------------
def reference_forward(raw, x):
    B, T, _ = x.shape
    cur = x
    for lp in raw["rnn"]:
        H = lp["w_hh"].shape[0]
        h = jnp.zeros((B, H), jnp.float32)
        outs = []
        for t in range(T):
            h = jnp.tanh(cur[:, t, :] @ lp["w_ih"].T + lp["b_ih"]
                         + h @ lp["w_hh"].T + lp["b_hh"])
            outs.append(h)
        cur = jnp.stack(outs, axis=1)
    flat = cur.reshape(B, -1)
    return flat @ raw["fc_w"].T + raw["fc_b"]


if __name__ == "__main__":
    batch, input_size, hidden_size, num_layers, classes = 2, 28, 32, 2, 10
    key = jax.random.PRNGKey(0)
    key, kx = jax.random.split(key)
    x = jax.random.normal(kx, (batch, SEQUENCE_LENGTH, input_size), jnp.float32)

    raw = init_raw_params(key, input_size, hidden_size, num_layers, classes, SEQUENCE_LENGTH)
    params = pack_params(raw, SEQUENCE_LENGTH)

    y = jax.block_until_ready(basic_rnn_forward(params, x))
    y_ref = reference_forward(raw, x)
    assert y.shape == (batch, classes)
    tol = 2e-2 if USE_BF16_MXU_OPERANDS else 1e-4
    assert jnp.allclose(y, y_ref, rtol=tol, atol=tol), float(jnp.max(jnp.abs(y - y_ref)))
    print("KERNEL_OK")
</pallas_src>

<mosaic_0001>
module attributes {stable_mosaic.version = 11 : i64} {
  func.func @kernel(%arg0: memref<224x28xf32, #tpu.memory_space<vmem>>, %arg1: memref<28x32xf32, #tpu.memory_space<vmem>>, %arg2: memref<32x32xf32, #tpu.memory_space<vmem>>, %arg3: memref<1x32xf32, #tpu.memory_space<vmem>>, %arg4: memref<32x32xf32, #tpu.memory_space<vmem>>, %arg5: memref<32x32xf32, #tpu.memory_space<vmem>>, %arg6: memref<1x32xf32, #tpu.memory_space<vmem>>, %arg7: memref<28x32x128xf32, #tpu.memory_space<vmem>>, %arg8: memref<1x128xf32, #tpu.memory_space<vmem>>, %arg9: memref<8x128xf32, #tpu.memory_space<vmem>>, %arg10: memref<224x32xf32, #tpu.memory_space<vmem>>) attributes {dimension_semantics = [], scalar_prefetch = 0 : i64, scratch_operands = 1 : i64, tpu.core_type = #tpu.core_type<tc>} {
    %c0 = arith.constant 0 : index
    %c0_0 = arith.constant 0 : index
    %0 = vector.load %arg0[%c0, %c0_0] : memref<224x28xf32, #tpu.memory_space<vmem>>, vector<224x28xf32>
    %c0_1 = arith.constant 0 : index
    %c0_2 = arith.constant 0 : index
    %1 = vector.load %arg1[%c0_1, %c0_2] : memref<28x32xf32, #tpu.memory_space<vmem>>, vector<28x32xf32>
    %c0_3 = arith.constant 0 : index
    %c0_4 = arith.constant 0 : index
    %2 = vector.load %arg2[%c0_3, %c0_4] : memref<32x32xf32, #tpu.memory_space<vmem>>, vector<32x32xf32>
    %c0_5 = arith.constant 0 : index
    %c0_6 = arith.constant 0 : index
    %3 = vector.load %arg3[%c0_5, %c0_6] : memref<1x32xf32, #tpu.memory_space<vmem>>, vector<1x32xf32>
    %cst = arith.constant dense<0.000000e+00> : vector<224x32xf32>
    %4 = tpu.matmul %0, %1, %cst {dimension_numbers = #tpu.dot_dimension_numbers<[1], [0], [0], [1], [0, 0, 1, 1], [], []>} : vector<224x28xf32>, vector<28x32xf32>, vector<224x32xf32> -> vector<224x32xf32>
    %5 = vector.broadcast %3 : vector<1x32xf32> to vector<224x32xf32>
    %6 = arith.addf %4, %5 : vector<224x32xf32>
    %cst_7 = arith.constant 0.000000e+00 : f32
    %7 = vector.broadcast %cst_7 : f32 to vector<8x32xf32>
    %8 = vector.extract_strided_slice %6 {offsets = [0, 0], sizes = [8, 32], strides = [1, 1]} : vector<224x32xf32> to vector<8x32xf32>
    %cst_8 = arith.constant dense<0.000000e+00> : vector<8x32xf32>
    %9 = tpu.matmul %7, %2, %cst_8 {dimension_numbers = #tpu.dot_dimension_numbers<[1], [0], [0], [1], [0, 0, 1, 1], [], []>} : vector<8x32xf32>, vector<32x32xf32>, vector<8x32xf32> -> vector<8x32xf32>
    %10 = arith.addf %8, %9 : vector<8x32xf32>
    %11 = math.tanh %10 : vector<8x32xf32>
    %c0_9 = arith.constant 0 : index
    %c0_10 = arith.constant 0 : index
    %12 = vector.load %arg10[%c0_9, %c0_10] : memref<224x32xf32, #tpu.memory_space<vmem>>, vector<8x32xf32>
    tpu.vector_store %arg10[%c0_9, %c0_10], %11 {strides = array<i32>} : memref<224x32xf32, #tpu.memory_space<vmem>>, vector<8x32xf32>,
    %13 = vector.extract_strided_slice %6 {offsets = [8, 0], sizes = [8, 32], strides = [1, 1]} : vector<224x32xf32> to vector<8x32xf32>
    %cst_11 = arith.constant dense<0.000000e+00> : vector<8x32xf32>
    %14 = tpu.matmul %11, %2, %cst_11 {dimension_numbers = #tpu.dot_dimension_numbers<[1], [0], [0], [1], [0, 0, 1, 1], [], []>} : vector<8x32xf32>, vector<32x32xf32>, vector<8x32xf32> -> vector<8x32xf32>
    %15 = arith.addf %13, %14 : vector<8x32xf32>
    %16 = math.tanh %15 : vector<8x32xf32>
    %c8 = arith.constant 8 : index
    %c0_12 = arith.constant 0 : index
    %17 = vector.load %arg10[%c8, %c0_12] : memref<224x32xf32, #tpu.memory_space<vmem>>, vector<8x32xf32>
    tpu.vector_store %arg10[%c8, %c0_12], %16 {strides = array<i32>} : memref<224x32xf32, #tpu.memory_space<vmem>>, vector<8x32xf32>,
    %18 = vector.extract_strided_slice %6 {offsets = [16, 0], sizes = [8, 32], strides = [1, 1]} : vector<224x32xf32> to vector<8x32xf32>
    %cst_13 = arith.constant dense<0.000000e+00> : vector<8x32xf32>
    %19 = tpu.matmul %16, %2, %cst_13 {dimension_numbers = #tpu.dot_dimension_numbers<[1], [0], [0], [1], [0, 0, 1, 1], [], []>} : vector<8x32xf32>, vector<32x32xf32>, vector<8x32xf32> -> vector<8x32xf32>
    %20 = arith.addf %18, %19 : vector<8x32xf32>
    %21 = math.tanh %20 : vector<8x32xf32>
    %c16 = arith.constant 16 : index
    %c0_14 = arith.constant 0 : index
    %22 = vector.load %arg10[%c16, %c0_14] : memref<224x32xf32, #tpu.memory_space<vmem>>, vector<8x32xf32>
    tpu.vector_store %arg10[%c16, %c0_14], %21 {strides = array<i32>} : memref<224x32xf32, #tpu.memory_space<vmem>>, vector<8x32xf32>,
    %23 = vector.extract_strided_slice %6 {offsets = [24, 0], sizes = [8, 32], strides = [1, 1]} : vector<224x32xf32> to vector<8x32xf32>
    %cst_15 = arith.constant dense<0.000000e+00> : vector<8x32xf32>
    %24 = tpu.matmul %21, %2, %cst_15 {dimension_numbers = #tpu.dot_dimension_numbers<[1], [0], [0], [1], [0, 0, 1, 1], [], []>} : vector<8x32xf32>, vector<32x32xf32>, vector<8x32xf32> -> vector<8x32xf32>
    %25 = arith.addf %23, %24 : vector<8x32xf32>
    %26 = math.tanh %25 : vector<8x32xf32>
    %c24 = arith.constant 24 : index
    %c0_16 = arith.constant 0 : index
    %27 = vector.load %arg10[%c24, %c0_16] : memref<224x32xf32, #tpu.memory_space<vmem>>, vector<8x32xf32>
    tpu.vector_store %arg10[%c24, %c0_16], %26 {strides = array<i32>} : memref<224x32xf32, #tpu.memory_space<vmem>>, vector<8x32xf32>,
    %28 = vector.extract_strided_slice %6 {offsets = [32, 0], sizes = [8, 32], strides = [1, 1]} : vector<224x32xf32> to vector<8x32xf32>
    %cst_17 = arith.constant dense<0.000000e+00> : vector<8x32xf32>
    %29 = tpu.matmul %26, %2, %cst_17 {dimension_numbers = #tpu.dot_dimension_numbers<[1], [0], [0], [1], [0, 0, 1, 1], [], []>} : vector<8x32xf32>, vector<32x32xf32>, vector<8x32xf32> -> vector<8x32xf32>
    %30 = arith.addf %28, %29 : vector<8x32xf32>
    %31 = math.tanh %30 : vector<8x32xf32>
    %c32 = arith.constant 32 : index
    %c0_18 = arith.constant 0 : index
    %32 = vector.load %arg10[%c32, %c0_18] : memref<224x32xf32, #tpu.memory_space<vmem>>, vector<8x32xf32>
    tpu.vector_store %arg10[%c32, %c0_18], %31 {strides = array<i32>} : memref<224x32xf32, #tpu.memory_space<vmem>>, vector<8x32xf32>,
    %33 = vector.extract_strided_slice %6 {offsets = [40, 0], sizes = [8, 32], strides = [1, 1]} : vector<224x32xf32> to vector<8x32xf32>
    %cst_19 = arith.constant dense<0.000000e+00> : vector<8x32xf32>
    %34 = tpu.matmul %31, %2, %cst_19 {dimension_numbers = #tpu.dot_dimension_numbers<[1], [0], [0], [1], [0, 0, 1, 1], [], []>} : vector<8x32xf32>, vector<32x32xf32>, vector<8x32xf32> -> vector<8x32xf32>
    %35 = arith.addf %33, %34 : vector<8x32xf32>
    %36 = math.tanh %35 : vector<8x32xf32>
    %c40 = arith.constant 40 : index
    %c0_20 = arith.constant 0 : index
    %37 = vector.load %arg10[%c40, %c0_20] : memref<224x32xf32, #tpu.memory_space<vmem>>, vector<8x32xf32>
    tpu.vector_store %arg10[%c40, %c0_20], %36 {strides = array<i32>} : memref<224x32xf32, #tpu.memory_space<vmem>>, vector<8x32xf32>,
    %38 = vector.extract_strided_slice %6 {offsets = [48, 0], sizes = [8, 32], strides = [1, 1]} : vector<224x32xf32> to vector<8x32xf32>
    %cst_21 = arith.constant dense<0.000000e+00> : vector<8x32xf32>
    %39 = tpu.matmul %36, %2, %cst_21 {dimension_numbers = #tpu.dot_dimension_numbers<[1], [0], [0], [1], [0, 0, 1, 1], [], []>} : vector<8x32xf32>, vector<32x32xf32>, vector<8x32xf32> -> vector<8x32xf32>
    %40 = arith.addf %38, %39 : vector<8x32xf32>
    %41 = math.tanh %40 : vector<8x32xf32>
    %c48 = arith.constant 48 : index
    %c0_22 = arith.constant 0 : index
    %42 = vector.load %arg10[%c48, %c0_22] : memref<224x32xf32, #tpu.memory_space<vmem>>, vector<8x32xf32>
    tpu.vector_store %arg10[%c48, %c0_22], %41 {strides = array<i32>} : memref<224x32xf32, #tpu.memory_space<vmem>>, vector<8x32xf32>,
    %43 = vector.extract_strided_slice %6 {offsets = [56, 0], sizes = [8, 32], strides = [1, 1]} : vector<224x32xf32> to vector<8x32xf32>
    %cst_23 = arith.constant dense<0.000000e+00> : vector<8x32xf32>
    %44 = tpu.matmul %41, %2, %cst_23 {dimension_numbers = #tpu.dot_dimension_numbers<[1], [0], [0], [1], [0, 0, 1, 1], [], []>} : vector<8x32xf32>, vector<32x32xf32>, vector<8x32xf32> -> vector<8x32xf32>
    %45 = arith.addf %43, %44 : vector<8x32xf32>
    %46 = math.tanh %45 : vector<8x32xf32>
    %c56 = arith.constant 56 : index
    %c0_24 = arith.constant 0 : index
    %47 = vector.load %arg10[%c56, %c0_24] : memref<224x32xf32, #tpu.memory_space<vmem>>, vector<8x32xf32>
    tpu.vector_store %arg10[%c56, %c0_24], %46 {strides = array<i32>} : memref<224x32xf32, #tpu.memory_space<vmem>>, vector<8x32xf32>,
    %48 = vector.extract_strided_slice %6 {offsets = [64, 0], sizes = [8, 32], strides = [1, 1]} : vector<224x32xf32> to vector<8x32xf32>
    %cst_25 = arith.constant dense<0.000000e+00> : vector<8x32xf32>
    %49 = tpu.matmul %46, %2, %cst_25 {dimension_numbers = #tpu.dot_dimension_numbers<[1], [0], [0], [1], [0, 0, 1, 1], [], []>} : vector<8x32xf32>, vector<32x32xf32>, vector<8x32xf32> -> vector<8x32xf32>
    %50 = arith.addf %48, %49 : vector<8x32xf32>
    %51 = math.tanh %50 : vector<8x32xf32>
    %c64 = arith.constant 64 : index
    %c0_26 = arith.constant 0 : index
    %52 = vector.load %arg10[%c64, %c0_26] : memref<224x32xf32, #tpu.memory_space<vmem>>, vector<8x32xf32>
    tpu.vector_store %arg10[%c64, %c0_26], %51 {strides = array<i32>} : memref<224x32xf32, #tpu.memory_space<vmem>>, vector<8x32xf32>,
    %53 = vector.extract_strided_slice %6 {offsets = [72, 0], sizes = [8, 32], strides = [1, 1]} : vector<224x32xf32> to vector<8x32xf32>
    %cst_27 = arith.constant dense<0.000000e+00> : vector<8x32xf32>
    %54 = tpu.matmul %51, %2, %cst_27 {dimension_numbers = #tpu.dot_dimension_numbers<[1], [0], [0], [1], [0, 0, 1, 1], [], []>} : vector<8x32xf32>, vector<32x32xf32>, vector<8x32xf32> -> vector<8x32xf32>
    %55 = arith.addf %53, %54 : vector<8x32xf32>
    %56 = math.tanh %55 : vector<8x32xf32>
    %c72 = arith.constant 72 : index
    %c0_28 = arith.constant 0 : index
    %57 = vector.load %arg10[%c72, %c0_28] : memref<224x32xf32, #tpu.memory_space<vmem>>, vector<8x32xf32>
    tpu.vector_store %arg10[%c72, %c0_28], %56 {strides = array<i32>} : memref<224x32xf32, #tpu.memory_space<vmem>>, vector<8x32xf32>,
    %58 = vector.extract_strided_slice %6 {offsets = [80, 0], sizes = [8, 32], strides = [1, 1]} : vector<224x32xf32> to vector<8x32xf32>
    %cst_29 = arith.constant dense<0.000000e+00> : vector<8x32xf32>
    %59 = tpu.matmul %56, %2, %cst_29 {dimension_numbers = #tpu.dot_dimension_numbers<[1], [0], [0], [1], [0, 0, 1, 1], [], []>} : vector<8x32xf32>, vector<32x32xf32>, vector<8x32xf32> -> vector<8x32xf32>
    %60 = arith.addf %58, %59 : vector<8x32xf32>
    %61 = math.tanh %60 : vector<8x32xf32>
    %c80 = arith.constant 80 : index
    %c0_30 = arith.constant 0 : index
    %62 = vector.load %arg10[%c80, %c0_30] : memref<224x32xf32, #tpu.memory_space<vmem>>, vector<8x32xf32>
    tpu.vector_store %arg10[%c80, %c0_30], %61 {strides = array<i32>} : memref<224x32xf32, #tpu.memory_space<vmem>>, vector<8x32xf32>,
    %63 = vector.extract_strided_slice %6 {offsets = [88, 0], sizes = [8, 32], strides = [1, 1]} : vector<224x32xf32> to vector<8x32xf32>
    %cst_31 = arith.constant dense<0.000000e+00> : vector<8x32xf32>
    %64 = tpu.matmul %61, %2, %cst_31 {dimension_numbers = #tpu.dot_dimension_numbers<[1], [0], [0], [1], [0, 0, 1, 1], [], []>} : vector<8x32xf32>, vector<32x32xf32>, vector<8x32xf32> -> vector<8x32xf32>
    %65 = arith.addf %63, %64 : vector<8x32xf32>
    %66 = math.tanh %65 : vector<8x32xf32>
    %c88 = arith.constant 88 : index
    %c0_32 = arith.constant 0 : index
    %67 = vector.load %arg10[%c88, %c0_32] : memref<224x32xf32, #tpu.memory_space<vmem>>, vector<8x32xf32>
    tpu.vector_store %arg10[%c88, %c0_32], %66 {strides = array<i32>} : memref<224x32xf32, #tpu.memory_space<vmem>>, vector<8x32xf32>,
    %68 = vector.extract_strided_slice %6 {offsets = [96, 0], sizes = [8, 32], strides = [1, 1]} : vector<224x32xf32> to vector<8x32xf32>
    %cst_33 = arith.constant dense<0.000000e+00> : vector<8x32xf32>
    %69 = tpu.matmul %66, %2, %cst_33 {dimension_numbers = #tpu.dot_dimension_numbers<[1], [0], [0], [1], [0, 0, 1, 1], [], []>} : vector<8x32xf32>, vector<32x32xf32>, vector<8x32xf32> -> vector<8x32xf32>
    %70 = arith.addf %68, %69 : vector<8x32xf32>
    %71 = math.tanh %70 : vector<8x32xf32>
    %c96 = arith.constant 96 : index
    %c0_34 = arith.constant 0 : index
    %72 = vector.load %arg10[%c96, %c0_34] : memref<224x32xf32, #tpu.memory_space<vmem>>, vector<8x32xf32>
    tpu.vector_store %arg10[%c96, %c0_34], %71 {strides = array<i32>} : memref<224x32xf32, #tpu.memory_space<vmem>>, vector<8x32xf32>,
    %73 = vector.extract_strided_slice %6 {offsets = [104, 0], sizes = [8, 32], strides = [1, 1]} : vector<224x32xf32> to vector<8x32xf32>
    %cst_35 = arith.constant dense<0.000000e+00> : vector<8x32xf32>
    %74 = tpu.matmul %71, %2, %cst_35 {dimension_numbers = #tpu.dot_dimension_numbers<[1], [0], [0], [1], [0, 0, 1, 1], [], []>} : vector<8x32xf32>, vector<32x32xf32>, vector<8x32xf32> -> vector<8x32xf32>
    %75 = arith.addf %73, %74 : vector<8x32xf32>
    %76 = math.tanh %75 : vector<8x32xf32>
    %c104 = arith.constant 104 : index
    %c0_36 = arith.constant 0 : index
    %77 = vector.load %arg10[%c104, %c0_36] : memref<224x32xf32, #tpu.memory_space<vmem>>, vector<8x32xf32>
    tpu.vector_store %arg10[%c104, %c0_36], %76 {strides = array<i32>} : memref<224x32xf32, #tpu.memory_space<vmem>>, vector<8x32xf32>,
    %78 = vector.extract_strided_slice %6 {offsets = [112, 0], sizes = [8, 32], strides = [1, 1]} : vector<224x32xf32> to vector<8x32xf32>
    %cst_37 = arith.constant dense<0.000000e+00> : vector<8x32xf32>
    %79 = tpu.matmul %76, %2, %cst_37 {dimension_numbers = #tpu.dot_dimension_numbers<[1], [0], [0], [1], [0, 0, 1, 1], [], []>} : vector<8x32xf32>, vector<32x32xf32>, vector<8x32xf32> -> vector<8x32xf32>
    %80 = arith.addf %78, %79 : vector<8x32xf32>
    %81 = math.tanh %80 : vector<8x32xf32>
    %c112 = arith.constant 112 : index
    %c0_38 = arith.constant 0 : index
    %82 = vector.load %arg10[%c112, %c0_38] : memref<224x32xf32, #tpu.memory_space<vmem>>, vector<8x32xf32>
    tpu.vector_store %arg10[%c112, %c0_38], %81 {strides = array<i32>} : memref<224x32xf32, #tpu.memory_space<vmem>>, vector<8x32xf32>,
    %83 = vector.extract_strided_slice %6 {offsets = [120, 0], sizes = [8, 32], strides = [1, 1]} : vector<224x32xf32> to vector<8x32xf32>
    %cst_39 = arith.constant dense<0.000000e+00> : vector<8x32xf32>
    %84 = tpu.matmul %81, %2, %cst_39 {dimension_numbers = #tpu.dot_dimension_numbers<[1], [0], [0], [1], [0, 0, 1, 1], [], []>} : vector<8x32xf32>, vector<32x32xf32>, vector<8x32xf32> -> vector<8x32xf32>
    %85 = arith.addf %83, %84 : vector<8x32xf32>
    %86 = math.tanh %85 : vector<8x32xf32>
    %c120 = arith.constant 120 : index
    %c0_40 = arith.constant 0 : index
    %87 = vector.load %arg10[%c120, %c0_40] : memref<224x32xf32, #tpu.memory_space<vmem>>, vector<8x32xf32>
    tpu.vector_store %arg10[%c120, %c0_40], %86 {strides = array<i32>} : memref<224x32xf32, #tpu.memory_space<vmem>>, vector<8x32xf32>,
    %88 = vector.extract_strided_slice %6 {offsets = [128, 0], sizes = [8, 32], strides = [1, 1]} : vector<224x32xf32> to vector<8x32xf32>
    %cst_41 = arith.constant dense<0.000000e+00> : vector<8x32xf32>
    %89 = tpu.matmul %86, %2, %cst_41 {dimension_numbers = #tpu.dot_dimension_numbers<[1], [0], [0], [1], [0, 0, 1, 1], [], []>} : vector<8x32xf32>, vector<32x32xf32>, vector<8x32xf32> -> vector<8x32xf32>
    %90 = arith.addf %88, %89 : vector<8x32xf32>
    %91 = math.tanh %90 : vector<8x32xf32>
    %c128 = arith.constant 128 : index
    %c0_42 = arith.constant 0 : index
    %92 = vector.load %arg10[%c128, %c0_42] : memref<224x32xf32, #tpu.memory_space<vmem>>, vector<8x32xf32>
    tpu.vector_store %arg10[%c128, %c0_42], %91 {strides = array<i32>} : memref<224x32xf32, #tpu.memory_space<vmem>>, vector<8x32xf32>,
    %93 = vector.extract_strided_slice %6 {offsets = [136, 0], sizes = [8, 32], strides = [1, 1]} : vector<224x32xf32> to vector<8x32xf32>
    %cst_43 = arith.constant dense<0.000000e+00> : vector<8x32xf32>
    %94 = tpu.matmul %91, %2, %cst_43 {dimension_numbers = #tpu.dot_dimension_numbers<[1], [0], [0], [1], [0, 0, 1, 1], [], []>} : vector<8x32xf32>, vector<32x32xf32>, vector<8x32xf32> -> vector<8x32xf32>
    %95 = arith.addf %93, %94 : vector<8x32xf32>
    %96 = math.tanh %95 : vector<8x32xf32>
    %c136 = arith.constant 136 : index
    %c0_44 = arith.constant 0 : index
    %97 = vector.load %arg10[%c136, %c0_44] : memref<224x32xf32, #tpu.memory_space<vmem>>, vector<8x32xf32>
    tpu.vector_store %arg10[%c136, %c0_44], %96 {strides = array<i32>} : memref<224x32xf32, #tpu.memory_space<vmem>>, vector<8x32xf32>,
    %98 = vector.extract_strided_slice %6 {offsets = [144, 0], sizes = [8, 32], strides = [1, 1]} : vector<224x32xf32> to vector<8x32xf32>
    %cst_45 = arith.constant dense<0.000000e+00> : vector<8x32xf32>
    %99 = tpu.matmul %96, %2, %cst_45 {dimension_numbers = #tpu.dot_dimension_numbers<[1], [0], [0], [1], [0, 0, 1, 1], [], []>} : vector<8x32xf32>, vector<32x32xf32>, vector<8x32xf32> -> vector<8x32xf32>
    %100 = arith.addf %98, %99 : vector<8x32xf32>
    %101 = math.tanh %100 : vector<8x32xf32>
    %c144 = arith.constant 144 : index
    %c0_46 = arith.constant 0 : index
    %102 = vector.load %arg10[%c144, %c0_46] : memref<224x32xf32, #tpu.memory_space<vmem>>, vector<8x32xf32>
    tpu.vector_store %arg10[%c144, %c0_46], %101 {strides = array<i32>} : memref<224x32xf32, #tpu.memory_space<vmem>>, vector<8x32xf32>,
    %103 = vector.extract_strided_slice %6 {offsets = [152, 0], sizes = [8, 32], strides = [1, 1]} : vector<224x32xf32> to vector<8x32xf32>
    %cst_47 = arith.constant dense<0.000000e+00> : vector<8x32xf32>
    %104 = tpu.matmul %101, %2, %cst_47 {dimension_numbers = #tpu.dot_dimension_numbers<[1], [0], [0], [1], [0, 0, 1, 1], [], []>} : vector<8x32xf32>, vector<32x32xf32>, vector<8x32xf32> -> vector<8x32xf32>
    %105 = arith.addf %103, %104 : vector<8x32xf32>
    %106 = math.tanh %105 : vector<8x32xf32>
    %c152 = arith.constant 152 : index
    %c0_48 = arith.constant 0 : index
    %107 = vector.load %arg10[%c152, %c0_48] : memref<224x32xf32, #tpu.memory_space<vmem>>, vector<8x32xf32>
    tpu.vector_store %arg10[%c152, %c0_48], %106 {strides = array<i32>} : memref<224x32xf32, #tpu.memory_space<vmem>>, vector<8x32xf32>,
    %108 = vector.extract_strided_slice %6 {offsets = [160, 0], sizes = [8, 32], strides = [1, 1]} : vector<224x32xf32> to vector<8x32xf32>
    %cst_49 = arith.constant dense<0.000000e+00> : vector<8x32xf32>
    %109 = tpu.matmul %106, %2, %cst_49 {dimension_numbers = #tpu.dot_dimension_numbers<[1], [0], [0], [1], [0, 0, 1, 1], [], []>} : vector<8x32xf32>, vector<32x32xf32>, vector<8x32xf32> -> vector<8x32xf32>
    %110 = arith.addf %108, %109 : vector<8x32xf32>
    %111 = math.tanh %110 : vector<8x32xf32>
    %c160 = arith.constant 160 : index
    %c0_50 = arith.constant 0 : index
    %112 = vector.load %arg10[%c160, %c0_50] : memref<224x32xf32, #tpu.memory_space<vmem>>, vector<8x32xf32>
    tpu.vector_store %arg10[%c160, %c0_50], %111 {strides = array<i32>} : memref<224x32xf32, #tpu.memory_space<vmem>>, vector<8x32xf32>,
    %113 = vector.extract_strided_slice %6 {offsets = [168, 0], sizes = [8, 32], strides = [1, 1]} : vector<224x32xf32> to vector<8x32xf32>
    %cst_51 = arith.constant dense<0.000000e+00> : vector<8x32xf32>
    %114 = tpu.matmul %111, %2, %cst_51 {dimension_numbers = #tpu.dot_dimension_numbers<[1], [0], [0], [1], [0, 0, 1, 1], [], []>} : vector<8x32xf32>, vector<32x32xf32>, vector<8x32xf32> -> vector<8x32xf32>
    %115 = arith.addf %113, %114 : vector<8x32xf32>
    %116 = math.tanh %115 : vector<8x32xf32>
    %c168 = arith.constant 168 : index
    %c0_52 = arith.constant 0 : index
    %117 = vector.load %arg10[%c168, %c0_52] : memref<224x32xf32, #tpu.memory_space<vmem>>, vector<8x32xf32>
    tpu.vector_store %arg10[%c168, %c0_52], %116 {strides = array<i32>} : memref<224x32xf32, #tpu.memory_space<vmem>>, vector<8x32xf32>,
    %118 = vector.extract_strided_slice %6 {offsets = [176, 0], sizes = [8, 32], strides = [1, 1]} : vector<224x32xf32> to vector<8x32xf32>
    %cst_53 = arith.constant dense<0.000000e+00> : vector<8x32xf32>
    %119 = tpu.matmul %116, %2, %cst_53 {dimension_numbers = #tpu.dot_dimension_numbers<[1], [0], [0], [1], [0, 0, 1, 1], [], []>} : vector<8x32xf32>, vector<32x32xf32>, vector<8x32xf32> -> vector<8x32xf32>
    %120 = arith.addf %118, %119 : vector<8x32xf32>
    %121 = math.tanh %120 : vector<8x32xf32>
    %c176 = arith.constant 176 : index
    %c0_54 = arith.constant 0 : index
    %122 = vector.load %arg10[%c176, %c0_54] : memref<224x32xf32, #tpu.memory_space<vmem>>, vector<8x32xf32>
    tpu.vector_store %arg10[%c176, %c0_54], %121 {strides = array<i32>} : memref<224x32xf32, #tpu.memory_space<vmem>>, vector<8x32xf32>,
    %123 = vector.extract_strided_slice %6 {offsets = [184, 0], sizes = [8, 32], strides = [1, 1]} : vector<224x32xf32> to vector<8x32xf32>
    %cst_55 = arith.constant dense<0.000000e+00> : vector<8x32xf32>
    %124 = tpu.matmul %121, %2, %cst_55 {dimension_numbers = #tpu.dot_dimension_numbers<[1], [0], [0], [1], [0, 0, 1, 1], [], []>} : vector<8x32xf32>, vector<32x32xf32>, vector<8x32xf32> -> vector<8x32xf32>
    %125 = arith.addf %123, %124 : vector<8x32xf32>
    %126 = math.tanh %125 : vector<8x32xf32>
    %c184 = arith.constant 184 : index
    %c0_56 = arith.constant 0 : index
    %127 = vector.load %arg10[%c184, %c0_56] : memref<224x32xf32, #tpu.memory_space<vmem>>, vector<8x32xf32>
    tpu.vector_store %arg10[%c184, %c0_56], %126 {strides = array<i32>} : memref<224x32xf32, #tpu.memory_space<vmem>>, vector<8x32xf32>,
    %128 = vector.extract_strided_slice %6 {offsets = [192, 0], sizes = [8, 32], strides = [1, 1]} : vector<224x32xf32> to vector<8x32xf32>
    %cst_57 = arith.constant dense<0.000000e+00> : vector<8x32xf32>
    %129 = tpu.matmul %126, %2, %cst_57 {dimension_numbers = #tpu.dot_dimension_numbers<[1], [0], [0], [1], [0, 0, 1, 1], [], []>} : vector<8x32xf32>, vector<32x32xf32>, vector<8x32xf32> -> vector<8x32xf32>
    %130 = arith.addf %128, %129 : vector<8x32xf32>
    %131 = math.tanh %130 : vector<8x32xf32>
    %c192 = arith.constant 192 : index
    %c0_58 = arith.constant 0 : index
    %132 = vector.load %arg10[%c192, %c0_58] : memref<224x32xf32, #tpu.memory_space<vmem>>, vector<8x32xf32>
    tpu.vector_store %arg10[%c192, %c0_58], %131 {strides = array<i32>} : memref<224x32xf32, #tpu.memory_space<vmem>>, vector<8x32xf32>,
    %133 = vector.extract_strided_slice %6 {offsets = [200, 0], sizes = [8, 32], strides = [1, 1]} : vector<224x32xf32> to vector<8x32xf32>
    %cst_59 = arith.constant dense<0.000000e+00> : vector<8x32xf32>
    %134 = tpu.matmul %131, %2, %cst_59 {dimension_numbers = #tpu.dot_dimension_numbers<[1], [0], [0], [1], [0, 0, 1, 1], [], []>} : vector<8x32xf32>, vector<32x32xf32>, vector<8x32xf32> -> vector<8x32xf32>
    %135 = arith.addf %133, %134 : vector<8x32xf32>
    %136 = math.tanh %135 : vector<8x32xf32>
    %c200 = arith.constant 200 : index
    %c0_60 = arith.constant 0 : index
    %137 = vector.load %arg10[%c200, %c0_60] : memref<224x32xf32, #tpu.memory_space<vmem>>, vector<8x32xf32>
    tpu.vector_store %arg10[%c200, %c0_60], %136 {strides = array<i32>} : memref<224x32xf32, #tpu.memory_space<vmem>>, vector<8x32xf32>,
    %138 = vector.extract_strided_slice %6 {offsets = [208, 0], sizes = [8, 32], strides = [1, 1]} : vector<224x32xf32> to vector<8x32xf32>
    %cst_61 = arith.constant dense<0.000000e+00> : vector<8x32xf32>
    %139 = tpu.matmul %136, %2, %cst_61 {dimension_numbers = #tpu.dot_dimension_numbers<[1], [0], [0], [1], [0, 0, 1, 1], [], []>} : vector<8x32xf32>, vector<32x32xf32>, vector<8x32xf32> -> vector<8x32xf32>
    %140 = arith.addf %138, %139 : vector<8x32xf32>
    %141 = math.tanh %140 : vector<8x32xf32>
    %c208 = arith.constant 208 : index
    %c0_62 = arith.constant 0 : index
    %142 = vector.load %arg10[%c208, %c0_62] : memref<224x32xf32, #tpu.memory_space<vmem>>, vector<8x32xf32>
    tpu.vector_store %arg10[%c208, %c0_62], %141 {strides = array<i32>} : memref<224x32xf32, #tpu.memory_space<vmem>>, vector<8x32xf32>,
    %143 = vector.extract_strided_slice %6 {offsets = [216, 0], sizes = [8, 32], strides = [1, 1]} : vector<224x32xf32> to vector<8x32xf32>
    %cst_63 = arith.constant dense<0.000000e+00> : vector<8x32xf32>
    %144 = tpu.matmul %141, %2, %cst_63 {dimension_numbers = #tpu.dot_dimension_numbers<[1], [0], [0], [1], [0, 0, 1, 1], [], []>} : vector<8x32xf32>, vector<32x32xf32>, vector<8x32xf32> -> vector<8x32xf32>
    %145 = arith.addf %143, %144 : vector<8x32xf32>
    %146 = math.tanh %145 : vector<8x32xf32>
    %c216 = arith.constant 216 : index
    %c0_64 = arith.constant 0 : index
    %147 = vector.load %arg10[%c216, %c0_64] : memref<224x32xf32, #tpu.memory_space<vmem>>, vector<8x32xf32>
    tpu.vector_store %arg10[%c216, %c0_64], %146 {strides = array<i32>} : memref<224x32xf32, #tpu.memory_space<vmem>>, vector<8x32xf32>,
    %c0_65 = arith.constant 0 : index
    %c0_66 = arith.constant 0 : index
    %148 = vector.load %arg10[%c0_65, %c0_66] : memref<224x32xf32, #tpu.memory_space<vmem>>, vector<224x32xf32>
    %c0_67 = arith.constant 0 : index
    %c0_68 = arith.constant 0 : index
    %149 = vector.load %arg4[%c0_67, %c0_68] : memref<32x32xf32, #tpu.memory_space<vmem>>, vector<32x32xf32>
    %c0_69 = arith.constant 0 : index
    %c0_70 = arith.constant 0 : index
    %150 = vector.load %arg5[%c0_69, %c0_70] : memref<32x32xf32, #tpu.memory_space<vmem>>, vector<32x32xf32>
    %c0_71 = arith.constant 0 : index
    %c0_72 = arith.constant 0 : index
    %151 = vector.load %arg6[%c0_71, %c0_72] : memref<1x32xf32, #tpu.memory_space<vmem>>, vector<1x32xf32>
    %cst_73 = arith.constant dense<0.000000e+00> : vector<224x32xf32>
    %152 = tpu.matmul %148, %149, %cst_73 {dimension_numbers = #tpu.dot_dimension_numbers<[1], [0], [0], [1], [0, 0, 1, 1], [], []>} : vector<224x32xf32>, vector<32x32xf32>, vector<224x32xf32> -> vector<224x32xf32>
    %153 = vector.broadcast %151 : vector<1x32xf32> to vector<224x32xf32>
    %154 = arith.addf %152, %153 : vector<224x32xf32>
    %cst_74 = arith.constant 0.000000e+00 : f32
    %155 = vector.broadcast %cst_74 : f32 to vector<8x32xf32>
    %c0_75 = arith.constant 0 : index
    %c0_76 = arith.constant 0 : index
    %156 = vector.load %arg8[%c0_75, %c0_76] : memref<1x128xf32, #tpu.memory_space<vmem>>, vector<1x128xf32>
    %cst_77 = arith.constant 0.000000e+00 : f32
    %157 = vector.broadcast %cst_77 : f32 to vector<8x128xf32>
    %158 = vector.extract_strided_slice %154 {offsets = [0, 0], sizes = [8, 32], strides = [1, 1]} : vector<224x32xf32> to vector<8x32xf32>
    %cst_78 = arith.constant dense<0.000000e+00> : vector<8x32xf32>
    %159 = tpu.matmul %155, %150, %cst_78 {dimension_numbers = #tpu.dot_dimension_numbers<[1], [0], [0], [1], [0, 0, 1, 1], [], []>} : vector<8x32xf32>, vector<32x32xf32>, vector<8x32xf32> -> vector<8x32xf32>
    %160 = arith.addf %158, %159 : vector<8x32xf32>
    %161 = math.tanh %160 : vector<8x32xf32>
    %c0_79 = arith.constant 0 : index
    %c0_80 = arith.constant 0 : index
    %c0_81 = arith.constant 0 : index
    %162 = vector.load %arg7[%c0_79, %c0_80, %c0_81] : memref<28x32x128xf32, #tpu.memory_space<vmem>>, vector<1x32x128xf32>
    %163 = vector.shape_cast %162 : vector<1x32x128xf32> to vector<32x128xf32>
    %cst_82 = arith.constant dense<0.000000e+00> : vector<8x128xf32>
    %164 = tpu.matmul %161, %163, %cst_82 {dimension_numbers = #tpu.dot_dimension_numbers<[1], [0], [0], [1], [0, 0, 1, 1], [], []>} : vector<8x32xf32>, vector<32x128xf32>, vector<8x128xf32> -> vector<8x128xf32>
    %165 = arith.addf %157, %164 : vector<8x128xf32>
    %166 = vector.extract_strided_slice %154 {offsets = [8, 0], sizes = [8, 32], strides = [1, 1]} : vector<224x32xf32> to vector<8x32xf32>
    %cst_83 = arith.constant dense<0.000000e+00> : vector<8x32xf32>
    %167 = tpu.matmul %161, %150, %cst_83 {dimension_numbers = #tpu.dot_dimension_numbers<[1], [0], [0], [1], [0, 0, 1, 1], [], []>} : vector<8x32xf32>, vector<32x32xf32>, vector<8x32xf32> -> vector<8x32xf32>
    %168 = arith.addf %166, %167 : vector<8x32xf32>
    %169 = math.tanh %168 : vector<8x32xf32>
    %c1 = arith.constant 1 : index
    %c0_84 = arith.constant 0 : index
    %c0_85 = arith.constant 0 : index
    %170 = vector.load %arg7[%c1, %c0_84, %c0_85] : memref<28x32x128xf32, #tpu.memory_space<vmem>>, vector<1x32x128xf32>
    %171 = vector.shape_cast %170 : vector<1x32x128xf32> to vector<32x128xf32>
    %cst_86 = arith.constant dense<0.000000e+00> : vector<8x128xf32>
    %172 = tpu.matmul %169, %171, %cst_86 {dimension_numbers = #tpu.dot_dimension_numbers<[1], [0], [0], [1], [0, 0, 1, 1], [], []>} : vector<8x32xf32>, vector<32x128xf32>, vector<8x128xf32> -> vector<8x128xf32>
    %173 = arith.addf %165, %172 : vector<8x128xf32>
    %174 = vector.extract_strided_slice %154 {offsets = [16, 0], sizes = [8, 32], strides = [1, 1]} : vector<224x32xf32> to vector<8x32xf32>
    %cst_87 = arith.constant dense<0.000000e+00> : vector<8x32xf32>
    %175 = tpu.matmul %169, %150, %cst_87 {dimension_numbers = #tpu.dot_dimension_numbers<[1], [0], [0], [1], [0, 0, 1, 1], [], []>} : vector<8x32xf32>, vector<32x32xf32>, vector<8x32xf32> -> vector<8x32xf32>
    %176 = arith.addf %174, %175 : vector<8x32xf32>
    %177 = math.tanh %176 : vector<8x32xf32>
    %c2 = arith.constant 2 : index
    %c0_88 = arith.constant 0 : index
    %c0_89 = arith.constant 0 : index
    %178 = vector.load %arg7[%c2, %c0_88, %c0_89] : memref<28x32x128xf32, #tpu.memory_space<vmem>>, vector<1x32x128xf32>
    %179 = vector.shape_cast %178 : vector<1x32x128xf32> to vector<32x128xf32>
    %cst_90 = arith.constant dense<0.000000e+00> : vector<8x128xf32>
    %180 = tpu.matmul %177, %179, %cst_90 {dimension_numbers = #tpu.dot_dimension_numbers<[1], [0], [0], [1], [0, 0, 1, 1], [], []>} : vector<8x32xf32>, vector<32x128xf32>, vector<8x128xf32> -> vector<8x128xf32>
    %181 = arith.addf %173, %180 : vector<8x128xf32>
    %182 = vector.extract_strided_slice %154 {offsets = [24, 0], sizes = [8, 32], strides = [1, 1]} : vector<224x32xf32> to vector<8x32xf32>
    %cst_91 = arith.constant dense<0.000000e+00> : vector<8x32xf32>
    %183 = tpu.matmul %177, %150, %cst_91 {dimension_numbers = #tpu.dot_dimension_numbers<[1], [0], [0], [1], [0, 0, 1, 1], [], []>} : vector<8x32xf32>, vector<32x32xf32>, vector<8x32xf32> -> vector<8x32xf32>
    %184 = arith.addf %182, %183 : vector<8x32xf32>
    %185 = math.tanh %184 : vector<8x32xf32>
    %c3 = arith.constant 3 : index
    %c0_92 = arith.constant 0 : index
    %c0_93 = arith.constant 0 : index
    %186 = vector.load %arg7[%c3, %c0_92, %c0_93] : memref<28x32x128xf32, #tpu.memory_space<vmem>>, vector<1x32x128xf32>
    %187 = vector.shape_cast %186 : vector<1x32x128xf32> to vector<32x128xf32>
    %cst_94 = arith.constant dense<0.000000e+00> : vector<8x128xf32>
    %188 = tpu.matmul %185, %187, %cst_94 {dimension_numbers = #tpu.dot_dimension_numbers<[1], [0], [0], [1], [0, 0, 1, 1], [], []>} : vector<8x32xf32>, vector<32x128xf32>, vector<8x128xf32> -> vector<8x128xf32>
    %189 = arith.addf %181, %188 : vector<8x128xf32>
    %190 = vector.extract_strided_slice %154 {offsets = [32, 0], sizes = [8, 32], strides = [1, 1]} : vector<224x32xf32> to vector<8x32xf32>
    %cst_95 = arith.constant dense<0.000000e+00> : vector<8x32xf32>
    %191 = tpu.matmul %185, %150, %cst_95 {dimension_numbers = #tpu.dot_dimension_numbers<[1], [0], [0], [1], [0, 0, 1, 1], [], []>} : vector<8x32xf32>, vector<32x32xf32>, vector<8x32xf32> -> vector<8x32xf32>
    %192 = arith.addf %190, %191 : vector<8x32xf32>
    %193 = math.tanh %192 : vector<8x32xf32>
    %c4 = arith.constant 4 : index
    %c0_96 = arith.constant 0 : index
    %c0_97 = arith.constant 0 : index
    %194 = vector.load %arg7[%c4, %c0_96, %c0_97] : memref<28x32x128xf32, #tpu.memory_space<vmem>>, vector<1x32x128xf32>
    %195 = vector.shape_cast %194 : vector<1x32x128xf32> to vector<32x128xf32>
    %cst_98 = arith.constant dense<0.000000e+00> : vector<8x128xf32>
    %196 = tpu.matmul %193, %195, %cst_98 {dimension_numbers = #tpu.dot_dimension_numbers<[1], [0], [0], [1], [0, 0, 1, 1], [], []>} : vector<8x32xf32>, vector<32x128xf32>, vector<8x128xf32> -> vector<8x128xf32>
    %197 = arith.addf %189, %196 : vector<8x128xf32>
    %198 = vector.extract_strided_slice %154 {offsets = [40, 0], sizes = [8, 32], strides = [1, 1]} : vector<224x32xf32> to vector<8x32xf32>
    %cst_99 = arith.constant dense<0.000000e+00> : vector<8x32xf32>
    %199 = tpu.matmul %193, %150, %cst_99 {dimension_numbers = #tpu.dot_dimension_numbers<[1], [0], [0], [1], [0, 0, 1, 1], [], []>} : vector<8x32xf32>, vector<32x32xf32>, vector<8x32xf32> -> vector<8x32xf32>
    %200 = arith.addf %198, %199 : vector<8x32xf32>
    %201 = math.tanh %200 : vector<8x32xf32>
    %c5 = arith.constant 5 : index
    %c0_100 = arith.constant 0 : index
    %c0_101 = arith.constant 0 : index
    %202 = vector.load %arg7[%c5, %c0_100, %c0_101] : memref<28x32x128xf32, #tpu.memory_space<vmem>>, vector<1x32x128xf32>
    %203 = vector.shape_cast %202 : vector<1x32x128xf32> to vector<32x128xf32>
    %cst_102 = arith.constant dense<0.000000e+00> : vector<8x128xf32>
    %204 = tpu.matmul %201, %203, %cst_102 {dimension_numbers = #tpu.dot_dimension_numbers<[1], [0], [0], [1], [0, 0, 1, 1], [], []>} : vector<8x32xf32>, vector<32x128xf32>, vector<8x128xf32> -> vector<8x128xf32>
    %205 = arith.addf %197, %204 : vector<8x128xf32>
    %206 = vector.extract_strided_slice %154 {offsets = [48, 0], sizes = [8, 32], strides = [1, 1]} : vector<224x32xf32> to vector<8x32xf32>
    %cst_103 = arith.constant dense<0.000000e+00> : vector<8x32xf32>
    %207 = tpu.matmul %201, %150, %cst_103 {dimension_numbers = #tpu.dot_dimension_numbers<[1], [0], [0], [1], [0, 0, 1, 1], [], []>} : vector<8x32xf32>, vector<32x32xf32>, vector<8x32xf32> -> vector<8x32xf32>
    %208 = arith.addf %206, %207 : vector<8x32xf32>
    %209 = math.tanh %208 : vector<8x32xf32>
    %c6 = arith.constant 6 : index
    %c0_104 = arith.constant 0 : index
    %c0_105 = arith.constant 0 : index
    %210 = vector.load %arg7[%c6, %c0_104, %c0_105] : memref<28x32x128xf32, #tpu.memory_space<vmem>>, vector<1x32x128xf32>
    %211 = vector.shape_cast %210 : vector<1x32x128xf32> to vector<32x128xf32>
    %cst_106 = arith.constant dense<0.000000e+00> : vector<8x128xf32>
    %212 = tpu.matmul %209, %211, %cst_106 {dimension_numbers = #tpu.dot_dimension_numbers<[1], [0], [0], [1], [0, 0, 1, 1], [], []>} : vector<8x32xf32>, vector<32x128xf32>, vector<8x128xf32> -> vector<8x128xf32>
    %213 = arith.addf %205, %212 : vector<8x128xf32>
    %214 = vector.extract_strided_slice %154 {offsets = [56, 0], sizes = [8, 32], strides = [1, 1]} : vector<224x32xf32> to vector<8x32xf32>
    %cst_107 = arith.constant dense<0.000000e+00> : vector<8x32xf32>
    %215 = tpu.matmul %209, %150, %cst_107 {dimension_numbers = #tpu.dot_dimension_numbers<[1], [0], [0], [1], [0, 0, 1, 1], [], []>} : vector<8x32xf32>, vector<32x32xf32>, vector<8x32xf32> -> vector<8x32xf32>
    %216 = arith.addf %214, %215 : vector<8x32xf32>
    %217 = math.tanh %216 : vector<8x32xf32>
    %c7 = arith.constant 7 : index
    %c0_108 = arith.constant 0 : index
    %c0_109 = arith.constant 0 : index
    %218 = vector.load %arg7[%c7, %c0_108, %c0_109] : memref<28x32x128xf32, #tpu.memory_space<vmem>>, vector<1x32x128xf32>
    %219 = vector.shape_cast %218 : vector<1x32x128xf32> to vector<32x128xf32>
    %cst_110 = arith.constant dense<0.000000e+00> : vector<8x128xf32>
    %220 = tpu.matmul %217, %219, %cst_110 {dimension_numbers = #tpu.dot_dimension_numbers<[1], [0], [0], [1], [0, 0, 1, 1], [], []>} : vector<8x32xf32>, vector<32x128xf32>, vector<8x128xf32> -> vector<8x128xf32>
    %221 = arith.addf %213, %220 : vector<8x128xf32>
    %222 = vector.extract_strided_slice %154 {offsets = [64, 0], sizes = [8, 32], strides = [1, 1]} : vector<224x32xf32> to vector<8x32xf32>
    %cst_111 = arith.constant dense<0.000000e+00> : vector<8x32xf32>
    %223 = tpu.matmul %217, %150, %cst_111 {dimension_numbers = #tpu.dot_dimension_numbers<[1], [0], [0], [1], [0, 0, 1, 1], [], []>} : vector<8x32xf32>, vector<32x32xf32>, vector<8x32xf32> -> vector<8x32xf32>
    %224 = arith.addf %222, %223 : vector<8x32xf32>
    %225 = math.tanh %224 : vector<8x32xf32>
    %c8_112 = arith.constant 8 : index
    %c0_113 = arith.constant 0 : index
    %c0_114 = arith.constant 0 : index
    %226 = vector.load %arg7[%c8_112, %c0_113, %c0_114] : memref<28x32x128xf32, #tpu.memory_space<vmem>>, vector<1x32x128xf32>
    %227 = vector.shape_cast %226 : vector<1x32x128xf32> to vector<32x128xf32>
    %cst_115 = arith.constant dense<0.000000e+00> : vector<8x128xf32>
    %228 = tpu.matmul %225, %227, %cst_115 {dimension_numbers = #tpu.dot_dimension_numbers<[1], [0], [0], [1], [0, 0, 1, 1], [], []>} : vector<8x32xf32>, vector<32x128xf32>, vector<8x128xf32> -> vector<8x128xf32>
    %229 = arith.addf %221, %228 : vector<8x128xf32>
    %230 = vector.extract_strided_slice %154 {offsets = [72, 0], sizes = [8, 32], strides = [1, 1]} : vector<224x32xf32> to vector<8x32xf32>
    %cst_116 = arith.constant dense<0.000000e+00> : vector<8x32xf32>
    %231 = tpu.matmul %225, %150, %cst_116 {dimension_numbers = #tpu.dot_dimension_numbers<[1], [0], [0], [1], [0, 0, 1, 1], [], []>} : vector<8x32xf32>, vector<32x32xf32>, vector<8x32xf32> -> vector<8x32xf32>
    %232 = arith.addf %230, %231 : vector<8x32xf32>
    %233 = math.tanh %232 : vector<8x32xf32>
    %c9 = arith.constant 9 : index
    %c0_117 = arith.constant 0 : index
    %c0_118 = arith.constant 0 : index
    %234 = vector.load %arg7[%c9, %c0_117, %c0_118] : memref<28x32x128xf32, #tpu.memory_space<vmem>>, vector<1x32x128xf32>
    %235 = vector.shape_cast %234 : vector<1x32x128xf32> to vector<32x128xf32>
    %cst_119 = arith.constant dense<0.000000e+00> : vector<8x128xf32>
    %236 = tpu.matmul %233, %235, %cst_119 {dimension_numbers = #tpu.dot_dimension_numbers<[1], [0], [0], [1], [0, 0, 1, 1], [], []>} : vector<8x32xf32>, vector<32x128xf32>, vector<8x128xf32> -> vector<8x128xf32>
    %237 = arith.addf %229, %236 : vector<8x128xf32>
    %238 = vector.extract_strided_slice %154 {offsets = [80, 0], sizes = [8, 32], strides = [1, 1]} : vector<224x32xf32> to vector<8x32xf32>
    %cst_120 = arith.constant dense<0.000000e+00> : vector<8x32xf32>
    %239 = tpu.matmul %233, %150, %cst_120 {dimension_numbers = #tpu.dot_dimension_numbers<[1], [0], [0], [1], [0, 0, 1, 1], [], []>} : vector<8x32xf32>, vector<32x32xf32>, vector<8x32xf32> -> vector<8x32xf32>
    %240 = arith.addf %238, %239 : vector<8x32xf32>
    %241 = math.tanh %240 : vector<8x32xf32>
    %c10 = arith.constant 10 : index
    %c0_121 = arith.constant 0 : index
    %c0_122 = arith.constant 0 : index
    %242 = vector.load %arg7[%c10, %c0_121, %c0_122] : memref<28x32x128xf32, #tpu.memory_space<vmem>>, vector<1x32x128xf32>
    %243 = vector.shape_cast %242 : vector<1x32x128xf32> to vector<32x128xf32>
    %cst_123 = arith.constant dense<0.000000e+00> : vector<8x128xf32>
    %244 = tpu.matmul %241, %243, %cst_123 {dimension_numbers = #tpu.dot_dimension_numbers<[1], [0], [0], [1], [0, 0, 1, 1], [], []>} : vector<8x32xf32>, vector<32x128xf32>, vector<8x128xf32> -> vector<8x128xf32>
    %245 = arith.addf %237, %244 : vector<8x128xf32>
    %246 = vector.extract_strided_slice %154 {offsets = [88, 0], sizes = [8, 32], strides = [1, 1]} : vector<224x32xf32> to vector<8x32xf32>
    %cst_124 = arith.constant dense<0.000000e+00> : vector<8x32xf32>
    %247 = tpu.matmul %241, %150, %cst_124 {dimension_numbers = #tpu.dot_dimension_numbers<[1], [0], [0], [1], [0, 0, 1, 1], [], []>} : vector<8x32xf32>, vector<32x32xf32>, vector<8x32xf32> -> vector<8x32xf32>
    %248 = arith.addf %246, %247 : vector<8x32xf32>
    %249 = math.tanh %248 : vector<8x32xf32>
    %c11 = arith.constant 11 : index
    %c0_125 = arith.constant 0 : index
    %c0_126 = arith.constant 0 : index
    %250 = vector.load %arg7[%c11, %c0_125, %c0_126] : memref<28x32x128xf32, #tpu.memory_space<vmem>>, vector<1x32x128xf32>
    %251 = vector.shape_cast %250 : vector<1x32x128xf32> to vector<32x128xf32>
    %cst_127 = arith.constant dense<0.000000e+00> : vector<8x128xf32>
    %252 = tpu.matmul %249, %251, %cst_127 {dimension_numbers = #tpu.dot_dimension_numbers<[1], [0], [0], [1], [0, 0, 1, 1], [], []>} : vector<8x32xf32>, vector<32x128xf32>, vector<8x128xf32> -> vector<8x128xf32>
    %253 = arith.addf %245, %252 : vector<8x128xf32>
    %254 = vector.extract_strided_slice %154 {offsets = [96, 0], sizes = [8, 32], strides = [1, 1]} : vector<224x32xf32> to vector<8x32xf32>
    %cst_128 = arith.constant dense<0.000000e+00> : vector<8x32xf32>
    %255 = tpu.matmul %249, %150, %cst_128 {dimension_numbers = #tpu.dot_dimension_numbers<[1], [0], [0], [1], [0, 0, 1, 1], [], []>} : vector<8x32xf32>, vector<32x32xf32>, vector<8x32xf32> -> vector<8x32xf32>
    %256 = arith.addf %254, %255 : vector<8x32xf32>
    %257 = math.tanh %256 : vector<8x32xf32>
    %c12 = arith.constant 12 : index
    %c0_129 = arith.constant 0 : index
    %c0_130 = arith.constant 0 : index
    %258 = vector.load %arg7[%c12, %c0_129, %c0_130] : memref<28x32x128xf32, #tpu.memory_space<vmem>>, vector<1x32x128xf32>
    %259 = vector.shape_cast %258 : vector<1x32x128xf32> to vector<32x128xf32>
    %cst_131 = arith.constant dense<0.000000e+00> : vector<8x128xf32>
    %260 = tpu.matmul %257, %259, %cst_131 {dimension_numbers = #tpu.dot_dimension_numbers<[1], [0], [0], [1], [0, 0, 1, 1], [], []>} : vector<8x32xf32>, vector<32x128xf32>, vector<8x128xf32> -> vector<8x128xf32>
    %261 = arith.addf %253, %260 : vector<8x128xf32>
    %262 = vector.extract_strided_slice %154 {offsets = [104, 0], sizes = [8, 32], strides = [1, 1]} : vector<224x32xf32> to vector<8x32xf32>
    %cst_132 = arith.constant dense<0.000000e+00> : vector<8x32xf32>
    %263 = tpu.matmul %257, %150, %cst_132 {dimension_numbers = #tpu.dot_dimension_numbers<[1], [0], [0], [1], [0, 0, 1, 1], [], []>} : vector<8x32xf32>, vector<32x32xf32>, vector<8x32xf32> -> vector<8x32xf32>
    %264 = arith.addf %262, %263 : vector<8x32xf32>
    %265 = math.tanh %264 : vector<8x32xf32>
    %c13 = arith.constant 13 : index
    %c0_133 = arith.constant 0 : index
    %c0_134 = arith.constant 0 : index
    %266 = vector.load %arg7[%c13, %c0_133, %c0_134] : memref<28x32x128xf32, #tpu.memory_space<vmem>>, vector<1x32x128xf32>
    %267 = vector.shape_cast %266 : vector<1x32x128xf32> to vector<32x128xf32>
    %cst_135 = arith.constant dense<0.000000e+00> : vector<8x128xf32>
    %268 = tpu.matmul %265, %267, %cst_135 {dimension_numbers = #tpu.dot_dimension_numbers<[1], [0], [0], [1], [0, 0, 1, 1], [], []>} : vector<8x32xf32>, vector<32x128xf32>, vector<8x128xf32> -> vector<8x128xf32>
    %269 = arith.addf %261, %268 : vector<8x128xf32>
    %270 = vector.extract_strided_slice %154 {offsets = [112, 0], sizes = [8, 32], strides = [1, 1]} : vector<224x32xf32> to vector<8x32xf32>
    %cst_136 = arith.constant dense<0.000000e+00> : vector<8x32xf32>
    %271 = tpu.matmul %265, %150, %cst_136 {dimension_numbers = #tpu.dot_dimension_numbers<[1], [0], [0], [1], [0, 0, 1, 1], [], []>} : vector<8x32xf32>, vector<32x32xf32>, vector<8x32xf32> -> vector<8x32xf32>
    %272 = arith.addf %270, %271 : vector<8x32xf32>
    %273 = math.tanh %272 : vector<8x32xf32>
    %c14 = arith.constant 14 : index
    %c0_137 = arith.constant 0 : index
    %c0_138 = arith.constant 0 : index
    %274 = vector.load %arg7[%c14, %c0_137, %c0_138] : memref<28x32x128xf32, #tpu.memory_space<vmem>>, vector<1x32x128xf32>
    %275 = vector.shape_cast %274 : vector<1x32x128xf32> to vector<32x128xf32>
    %cst_139 = arith.constant dense<0.000000e+00> : vector<8x128xf32>
    %276 = tpu.matmul %273, %275, %cst_139 {dimension_numbers = #tpu.dot_dimension_numbers<[1], [0], [0], [1], [0, 0, 1, 1], [], []>} : vector<8x32xf32>, vector<32x128xf32>, vector<8x128xf32> -> vector<8x128xf32>
    %277 = arith.addf %269, %276 : vector<8x128xf32>
    %278 = vector.extract_strided_slice %154 {offsets = [120, 0], sizes = [8, 32], strides = [1, 1]} : vector<224x32xf32> to vector<8x32xf32>
    %cst_140 = arith.constant dense<0.000000e+00> : vector<8x32xf32>
    %279 = tpu.matmul %273, %150, %cst_140 {dimension_numbers = #tpu.dot_dimension_numbers<[1], [0], [0], [1], [0, 0, 1, 1], [], []>} : vector<8x32xf32>, vector<32x32xf32>, vector<8x32xf32> -> vector<8x32xf32>
    %280 = arith.addf %278, %279 : vector<8x32xf32>
    %281 = math.tanh %280 : vector<8x32xf32>
    %c15 = arith.constant 15 : index
    %c0_141 = arith.constant 0 : index
    %c0_142 = arith.constant 0 : index
    %282 = vector.load %arg7[%c15, %c0_141, %c0_142] : memref<28x32x128xf32, #tpu.memory_space<vmem>>, vector<1x32x128xf32>
    %283 = vector.shape_cast %282 : vector<1x32x128xf32> to vector<32x128xf32>
    %cst_143 = arith.constant dense<0.000000e+00> : vector<8x128xf32>
    %284 = tpu.matmul %281, %283, %cst_143 {dimension_numbers = #tpu.dot_dimension_numbers<[1], [0], [0], [1], [0, 0, 1, 1], [], []>} : vector<8x32xf32>, vector<32x128xf32>, vector<8x128xf32> -> vector<8x128xf32>
    %285 = arith.addf %277, %284 : vector<8x128xf32>
    %286 = vector.extract_strided_slice %154 {offsets = [128, 0], sizes = [8, 32], strides = [1, 1]} : vector<224x32xf32> to vector<8x32xf32>
    %cst_144 = arith.constant dense<0.000000e+00> : vector<8x32xf32>
    %287 = tpu.matmul %281, %150, %cst_144 {dimension_numbers = #tpu.dot_dimension_numbers<[1], [0], [0], [1], [0, 0, 1, 1], [], []>} : vector<8x32xf32>, vector<32x32xf32>, vector<8x32xf32> -> vector<8x32xf32>
    %288 = arith.addf %286, %287 : vector<8x32xf32>
    %289 = math.tanh %288 : vector<8x32xf32>
    %c16_145 = arith.constant 16 : index
    %c0_146 = arith.constant 0 : index
    %c0_147 = arith.constant 0 : index
    %290 = vector.load %arg7[%c16_145, %c0_146, %c0_147] : memref<28x32x128xf32, #tpu.memory_space<vmem>>, vector<1x32x128xf32>
    %291 = vector.shape_cast %290 : vector<1x32x128xf32> to vector<32x128xf32>
    %cst_148 = arith.constant dense<0.000000e+00> : vector<8x128xf32>
    %292 = tpu.matmul %289, %291, %cst_148 {dimension_numbers = #tpu.dot_dimension_numbers<[1], [0], [0], [1], [0, 0, 1, 1], [], []>} : vector<8x32xf32>, vector<32x128xf32>, vector<8x128xf32> -> vector<8x128xf32>
    %293 = arith.addf %285, %292 : vector<8x128xf32>
    %294 = vector.extract_strided_slice %154 {offsets = [136, 0], sizes = [8, 32], strides = [1, 1]} : vector<224x32xf32> to vector<8x32xf32>
    %cst_149 = arith.constant dense<0.000000e+00> : vector<8x32xf32>
    %295 = tpu.matmul %289, %150, %cst_149 {dimension_numbers = #tpu.dot_dimension_numbers<[1], [0], [0], [1], [0, 0, 1, 1], [], []>} : vector<8x32xf32>, vector<32x32xf32>, vector<8x32xf32> -> vector<8x32xf32>
    %296 = arith.addf %294, %295 : vector<8x32xf32>
    %297 = math.tanh %296 : vector<8x32xf32>
    %c17 = arith.constant 17 : index
    %c0_150 = arith.constant 0 : index
    %c0_151 = arith.constant 0 : index
    %298 = vector.load %arg7[%c17, %c0_150, %c0_151] : memref<28x32x128xf32, #tpu.memory_space<vmem>>, vector<1x32x128xf32>
    %299 = vector.shape_cast %298 : vector<1x32x128xf32> to vector<32x128xf32>
    %cst_152 = arith.constant dense<0.000000e+00> : vector<8x128xf32>
    %300 = tpu.matmul %297, %299, %cst_152 {dimension_numbers = #tpu.dot_dimension_numbers<[1], [0], [0], [1], [0, 0, 1, 1], [], []>} : vector<8x32xf32>, vector<32x128xf32>, vector<8x128xf32> -> vector<8x128xf32>
    %301 = arith.addf %293, %300 : vector<8x128xf32>
    %302 = vector.extract_strided_slice %154 {offsets = [144, 0], sizes = [8, 32], strides = [1, 1]} : vector<224x32xf32> to vector<8x32xf32>
    %cst_153 = arith.constant dense<0.000000e+00> : vector<8x32xf32>
    %303 = tpu.matmul %297, %150, %cst_153 {dimension_numbers = #tpu.dot_dimension_numbers<[1], [0], [0], [1], [0, 0, 1, 1], [], []>} : vector<8x32xf32>, vector<32x32xf32>, vector<8x32xf32> -> vector<8x32xf32>
    %304 = arith.addf %302, %303 : vector<8x32xf32>
    %305 = math.tanh %304 : vector<8x32xf32>
    %c18 = arith.constant 18 : index
    %c0_154 = arith.constant 0 : index
    %c0_155 = arith.constant 0 : index
    %306 = vector.load %arg7[%c18, %c0_154, %c0_155] : memref<28x32x128xf32, #tpu.memory_space<vmem>>, vector<1x32x128xf32>
    %307 = vector.shape_cast %306 : vector<1x32x128xf32> to vector<32x128xf32>
    %cst_156 = arith.constant dense<0.000000e+00> : vector<8x128xf32>
    %308 = tpu.matmul %305, %307, %cst_156 {dimension_numbers = #tpu.dot_dimension_numbers<[1], [0], [0], [1], [0, 0, 1, 1], [], []>} : vector<8x32xf32>, vector<32x128xf32>, vector<8x128xf32> -> vector<8x128xf32>
    %309 = arith.addf %301, %308 : vector<8x128xf32>
    %310 = vector.extract_strided_slice %154 {offsets = [152, 0], sizes = [8, 32], strides = [1, 1]} : vector<224x32xf32> to vector<8x32xf32>
    %cst_157 = arith.constant dense<0.000000e+00> : vector<8x32xf32>
    %311 = tpu.matmul %305, %150, %cst_157 {dimension_numbers = #tpu.dot_dimension_numbers<[1], [0], [0], [1], [0, 0, 1, 1], [], []>} : vector<8x32xf32>, vector<32x32xf32>, vector<8x32xf32> -> vector<8x32xf32>
    %312 = arith.addf %310, %311 : vector<8x32xf32>
    %313 = math.tanh %312 : vector<8x32xf32>
    %c19 = arith.constant 19 : index
    %c0_158 = arith.constant 0 : index
    %c0_159 = arith.constant 0 : index
    %314 = vector.load %arg7[%c19, %c0_158, %c0_159] : memref<28x32x128xf32, #tpu.memory_space<vmem>>, vector<1x32x128xf32>
    %315 = vector.shape_cast %314 : vector<1x32x128xf32> to vector<32x128xf32>
    %cst_160 = arith.constant dense<0.000000e+00> : vector<8x128xf32>
    %316 = tpu.matmul %313, %315, %cst_160 {dimension_numbers = #tpu.dot_dimension_numbers<[1], [0], [0], [1], [0, 0, 1, 1], [], []>} : vector<8x32xf32>, vector<32x128xf32>, vector<8x128xf32> -> vector<8x128xf32>
    %317 = arith.addf %309, %316 : vector<8x128xf32>
    %318 = vector.extract_strided_slice %154 {offsets = [160, 0], sizes = [8, 32], strides = [1, 1]} : vector<224x32xf32> to vector<8x32xf32>
    %cst_161 = arith.constant dense<0.000000e+00> : vector<8x32xf32>
    %319 = tpu.matmul %313, %150, %cst_161 {dimension_numbers = #tpu.dot_dimension_numbers<[1], [0], [0], [1], [0, 0, 1, 1], [], []>} : vector<8x32xf32>, vector<32x32xf32>, vector<8x32xf32> -> vector<8x32xf32>
    %320 = arith.addf %318, %319 : vector<8x32xf32>
    %321 = math.tanh %320 : vector<8x32xf32>
    %c20 = arith.constant 20 : index
    %c0_162 = arith.constant 0 : index
    %c0_163 = arith.constant 0 : index
    %322 = vector.load %arg7[%c20, %c0_162, %c0_163] : memref<28x32x128xf32, #tpu.memory_space<vmem>>, vector<1x32x128xf32>
    %323 = vector.shape_cast %322 : vector<1x32x128xf32> to vector<32x128xf32>
    %cst_164 = arith.constant dense<0.000000e+00> : vector<8x128xf32>
    %324 = tpu.matmul %321, %323, %cst_164 {dimension_numbers = #tpu.dot_dimension_numbers<[1], [0], [0], [1], [0, 0, 1, 1], [], []>} : vector<8x32xf32>, vector<32x128xf32>, vector<8x128xf32> -> vector<8x128xf32>
    %325 = arith.addf %317, %324 : vector<8x128xf32>
    %326 = vector.extract_strided_slice %154 {offsets = [168, 0], sizes = [8, 32], strides = [1, 1]} : vector<224x32xf32> to vector<8x32xf32>
    %cst_165 = arith.constant dense<0.000000e+00> : vector<8x32xf32>
    %327 = tpu.matmul %321, %150, %cst_165 {dimension_numbers = #tpu.dot_dimension_numbers<[1], [0], [0], [1], [0, 0, 1, 1], [], []>} : vector<8x32xf32>, vector<32x32xf32>, vector<8x32xf32> -> vector<8x32xf32>
    %328 = arith.addf %326, %327 : vector<8x32xf32>
    %329 = math.tanh %328 : vector<8x32xf32>
    %c21 = arith.constant 21 : index
    %c0_166 = arith.constant 0 : index
    %c0_167 = arith.constant 0 : index
    %330 = vector.load %arg7[%c21, %c0_166, %c0_167] : memref<28x32x128xf32, #tpu.memory_space<vmem>>, vector<1x32x128xf32>
    %331 = vector.shape_cast %330 : vector<1x32x128xf32> to vector<32x128xf32>
    %cst_168 = arith.constant dense<0.000000e+00> : vector<8x128xf32>
    %332 = tpu.matmul %329, %331, %cst_168 {dimension_numbers = #tpu.dot_dimension_numbers<[1], [0], [0], [1], [0, 0, 1, 1], [], []>} : vector<8x32xf32>, vector<32x128xf32>, vector<8x128xf32> -> vector<8x128xf32>
    %333 = arith.addf %325, %332 : vector<8x128xf32>
    %334 = vector.extract_strided_slice %154 {offsets = [176, 0], sizes = [8, 32], strides = [1, 1]} : vector<224x32xf32> to vector<8x32xf32>
    %cst_169 = arith.constant dense<0.000000e+00> : vector<8x32xf32>
    %335 = tpu.matmul %329, %150, %cst_169 {dimension_numbers = #tpu.dot_dimension_numbers<[1], [0], [0], [1], [0, 0, 1, 1], [], []>} : vector<8x32xf32>, vector<32x32xf32>, vector<8x32xf32> -> vector<8x32xf32>
    %336 = arith.addf %334, %335 : vector<8x32xf32>
    %337 = math.tanh %336 : vector<8x32xf32>
    %c22 = arith.constant 22 : index
    %c0_170 = arith.constant 0 : index
    %c0_171 = arith.constant 0 : index
    %338 = vector.load %arg7[%c22, %c0_170, %c0_171] : memref<28x32x128xf32, #tpu.memory_space<vmem>>, vector<1x32x128xf32>
    %339 = vector.shape_cast %338 : vector<1x32x128xf32> to vector<32x128xf32>
    %cst_172 = arith.constant dense<0.000000e+00> : vector<8x128xf32>
    %340 = tpu.matmul %337, %339, %cst_172 {dimension_numbers = #tpu.dot_dimension_numbers<[1], [0], [0], [1], [0, 0, 1, 1], [], []>} : vector<8x32xf32>, vector<32x128xf32>, vector<8x128xf32> -> vector<8x128xf32>
    %341 = arith.addf %333, %340 : vector<8x128xf32>
    %342 = vector.extract_strided_slice %154 {offsets = [184, 0], sizes = [8, 32], strides = [1, 1]} : vector<224x32xf32> to vector<8x32xf32>
    %cst_173 = arith.constant dense<0.000000e+00> : vector<8x32xf32>
    %343 = tpu.matmul %337, %150, %cst_173 {dimension_numbers = #tpu.dot_dimension_numbers<[1], [0], [0], [1], [0, 0, 1, 1], [], []>} : vector<8x32xf32>, vector<32x32xf32>, vector<8x32xf32> -> vector<8x32xf32>
    %344 = arith.addf %342, %343 : vector<8x32xf32>
    %345 = math.tanh %344 : vector<8x32xf32>
    %c23 = arith.constant 23 : index
    %c0_174 = arith.constant 0 : index
    %c0_175 = arith.constant 0 : index
    %346 = vector.load %arg7[%c23, %c0_174, %c0_175] : memref<28x32x128xf32, #tpu.memory_space<vmem>>, vector<1x32x128xf32>
    %347 = vector.shape_cast %346 : vector<1x32x128xf32> to vector<32x128xf32>
    %cst_176 = arith.constant dense<0.000000e+00> : vector<8x128xf32>
    %348 = tpu.matmul %345, %347, %cst_176 {dimension_numbers = #tpu.dot_dimension_numbers<[1], [0], [0], [1], [0, 0, 1, 1], [], []>} : vector<8x32xf32>, vector<32x128xf32>, vector<8x128xf32> -> vector<8x128xf32>
    %349 = arith.addf %341, %348 : vector<8x128xf32>
    %350 = vector.extract_strided_slice %154 {offsets = [192, 0], sizes = [8, 32], strides = [1, 1]} : vector<224x32xf32> to vector<8x32xf32>
    %cst_177 = arith.constant dense<0.000000e+00> : vector<8x32xf32>
    %351 = tpu.matmul %345, %150, %cst_177 {dimension_numbers = #tpu.dot_dimension_numbers<[1], [0], [0], [1], [0, 0, 1, 1], [], []>} : vector<8x32xf32>, vector<32x32xf32>, vector<8x32xf32> -> vector<8x32xf32>
    %352 = arith.addf %350, %351 : vector<8x32xf32>
    %353 = math.tanh %352 : vector<8x32xf32>
    %c24_178 = arith.constant 24 : index
    %c0_179 = arith.constant 0 : index
    %c0_180 = arith.constant 0 : index
    %354 = vector.load %arg7[%c24_178, %c0_179, %c0_180] : memref<28x32x128xf32, #tpu.memory_space<vmem>>, vector<1x32x128xf32>
    %355 = vector.shape_cast %354 : vector<1x32x128xf32> to vector<32x128xf32>
    %cst_181 = arith.constant dense<0.000000e+00> : vector<8x128xf32>
    %356 = tpu.matmul %353, %355, %cst_181 {dimension_numbers = #tpu.dot_dimension_numbers<[1], [0], [0], [1], [0, 0, 1, 1], [], []>} : vector<8x32xf32>, vector<32x128xf32>, vector<8x128xf32> -> vector<8x128xf32>
    %357 = arith.addf %349, %356 : vector<8x128xf32>
    %358 = vector.extract_strided_slice %154 {offsets = [200, 0], sizes = [8, 32], strides = [1, 1]} : vector<224x32xf32> to vector<8x32xf32>
    %cst_182 = arith.constant dense<0.000000e+00> : vector<8x32xf32>
    %359 = tpu.matmul %353, %150, %cst_182 {dimension_numbers = #tpu.dot_dimension_numbers<[1], [0], [0], [1], [0, 0, 1, 1], [], []>} : vector<8x32xf32>, vector<32x32xf32>, vector<8x32xf32> -> vector<8x32xf32>
    %360 = arith.addf %358, %359 : vector<8x32xf32>
    %361 = math.tanh %360 : vector<8x32xf32>
    %c25 = arith.constant 25 : index
    %c0_183 = arith.constant 0 : index
    %c0_184 = arith.constant 0 : index
    %362 = vector.load %arg7[%c25, %c0_183, %c0_184] : memref<28x32x128xf32, #tpu.memory_space<vmem>>, vector<1x32x128xf32>
    %363 = vector.shape_cast %362 : vector<1x32x128xf32> to vector<32x128xf32>
    %cst_185 = arith.constant dense<0.000000e+00> : vector<8x128xf32>
    %364 = tpu.matmul %361, %363, %cst_185 {dimension_numbers = #tpu.dot_dimension_numbers<[1], [0], [0], [1], [0, 0, 1, 1], [], []>} : vector<8x32xf32>, vector<32x128xf32>, vector<8x128xf32> -> vector<8x128xf32>
    %365 = arith.addf %357, %364 : vector<8x128xf32>
    %366 = vector.extract_strided_slice %154 {offsets = [208, 0], sizes = [8, 32], strides = [1, 1]} : vector<224x32xf32> to vector<8x32xf32>
    %cst_186 = arith.constant dense<0.000000e+00> : vector<8x32xf32>
    %367 = tpu.matmul %361, %150, %cst_186 {dimension_numbers = #tpu.dot_dimension_numbers<[1], [0], [0], [1], [0, 0, 1, 1], [], []>} : vector<8x32xf32>, vector<32x32xf32>, vector<8x32xf32> -> vector<8x32xf32>
    %368 = arith.addf %366, %367 : vector<8x32xf32>
    %369 = math.tanh %368 : vector<8x32xf32>
    %c26 = arith.constant 26 : index
    %c0_187 = arith.constant 0 : index
    %c0_188 = arith.constant 0 : index
    %370 = vector.load %arg7[%c26, %c0_187, %c0_188] : memref<28x32x128xf32, #tpu.memory_space<vmem>>, vector<1x32x128xf32>
    %371 = vector.shape_cast %370 : vector<1x32x128xf32> to vector<32x128xf32>
    %cst_189 = arith.constant dense<0.000000e+00> : vector<8x128xf32>
    %372 = tpu.matmul %369, %371, %cst_189 {dimension_numbers = #tpu.dot_dimension_numbers<[1], [0], [0], [1], [0, 0, 1, 1], [], []>} : vector<8x32xf32>, vector<32x128xf32>, vector<8x128xf32> -> vector<8x128xf32>
    %373 = arith.addf %365, %372 : vector<8x128xf32>
    %374 = vector.extract_strided_slice %154 {offsets = [216, 0], sizes = [8, 32], strides = [1, 1]} : vector<224x32xf32> to vector<8x32xf32>
    %cst_190 = arith.constant dense<0.000000e+00> : vector<8x32xf32>
    %375 = tpu.matmul %369, %150, %cst_190 {dimension_numbers = #tpu.dot_dimension_numbers<[1], [0], [0], [1], [0, 0, 1, 1], [], []>} : vector<8x32xf32>, vector<32x32xf32>, vector<8x32xf32> -> vector<8x32xf32>
    %376 = arith.addf %374, %375 : vector<8x32xf32>
    %377 = math.tanh %376 : vector<8x32xf32>
    %c27 = arith.constant 27 : index
    %c0_191 = arith.constant 0 : index
    %c0_192 = arith.constant 0 : index
    %378 = vector.load %arg7[%c27, %c0_191, %c0_192] : memref<28x32x128xf32, #tpu.memory_space<vmem>>, vector<1x32x128xf32>
    %379 = vector.shape_cast %378 : vector<1x32x128xf32> to vector<32x128xf32>
    %cst_193 = arith.constant dense<0.000000e+00> : vector<8x128xf32>
    %380 = tpu.matmul %377, %379, %cst_193 {dimension_numbers = #tpu.dot_dimension_numbers<[1], [0], [0], [1], [0, 0, 1, 1], [], []>} : vector<8x32xf32>, vector<32x128xf32>, vector<8x128xf32> -> vector<8x128xf32>
    %381 = arith.addf %373, %380 : vector<8x128xf32>
    %382 = vector.broadcast %156 : vector<1x128xf32> to vector<8x128xf32>
    %383 = arith.addf %381, %382 : vector<8x128xf32>
    %c0_194 = arith.constant 0 : index
    %c0_195 = arith.constant 0 : index
    %384 = vector.load %arg9[%c0_194, %c0_195] : memref<8x128xf32, #tpu.memory_space<vmem>>, vector<8x128xf32>
    tpu.vector_store %arg9[%c0_194, %c0_195], %383 {strides = array<i32>} : memref<8x128xf32, #tpu.memory_space<vmem>>, vector<8x128xf32>,
    return
  }
}

</mosaic_0001>

<bundles_post_ra>
// kernel: tpu_custom_call.1
= control target key start
LH: loop header
LB: loop body
LE: loop exit
PB: predicated region body
PF: predicated region fallthrough
CT: control target
= control target key end

     0   :  { %14 = vsyncpa [#allocation4], 0  ;;  %s3758_s0 = inlined_call_operand.vmem [shape: f32[224,28], index: 0, kind: input, shape index: {}]   ;;  %s3759_s1 = inlined_call_operand.vmem [shape: f32[28,32], index: 1, kind: input, shape index: {}]   ;;  %s3760_s2 = inlined_call_operand.vmem [shape: f32[32,32], index: 2, kind: input, shape index: {}]   ;;  %s3761_s3 = inlined_call_operand.vmem [shape: f32[1,32], index: 3, kind: input, shape index: {}]   ;;  %s3762_s4 = inlined_call_operand.vmem [shape: f32[32,32], index: 4, kind: input, shape index: {}]   ;;  %s3763_s5 = inlined_call_operand.vmem [shape: f32[32,32], index: 5, kind: input, shape index: {}]   ;;  %s3764_s6 = inlined_call_operand.vmem [shape: f32[1,32], index: 6, kind: input, shape index: {}]   ;;  %s3765_s7 = inlined_call_operand.hbm [shape: f32[28,32,128], index: 7, kind: input, shape index: {}]   ;;  %s3766_s8 = inlined_call_operand.vmem [shape: f32[1,128], index: 8, kind: input, shape index: {}]   ;;  %s3767_s9 = inlined_call_operand.hbm [shape: f32[8,128], index: 9, kind: output, shape index: {}]  }
   0x1   :  { %15 = vsyncpa [#allocation5], 0  ;;  %s34_s11 = sshll.u32 %s3765_s7, 4  ;;  %s2997_s12 = smov [#allocation3]   ;;  %s35_s11 = int_to_ptr.hbm [resolvable:$true] %s34_s11 }
   0x2   :  { %s36_s13 = sshll.u32 %s2997_s12, 4  ;;  %s2998_s14 = smov 128   ;;  %s37_s13 = int_to_ptr.vmem [resolvable:$true] %s36_s13 }
   0x3   :  { %s2999_s15 = smov 8  }
   0x4   :  { %42 = dma.hbm_to_vmem [thread:$0]  %s35_s11, 14336, %s37_s13, [#allocation4], %s2998_s14, %s2998_s14, %s2999_s15  }
   0x5   :  { %2993 = dma.done.wait [#allocation4], 14336  }
   0x6   :  { %2994 = vsyncadd [#allocation4], 4294952960  ;;  %vm174_vm0 = vcmask 1043456   ;;  %v80_v0 = vld [vmem:[%s3759_s1 + $0x18] sm:$0xf]  ;;  %v79_v1 = vld [vmem:[%s3759_s1 + $0x10] sm:$0xff] }
   0x7   :  { %v3064_v2 = vld [vmem:[%s3760_s2 + $0x18] sm:$0xff]  ;;  %2681 = vmatpush.msk.msra.mxu0 %vm174_vm0, %v80_v0  ;;  %v3070_v3 = vld [vmem:[%s3760_s2 + $0x10] sm:$0xff]  ;;  %v78_v4 = vld [vmem:[%s3759_s1 + $0x8] sm:$0xff]  ;;  %vm89_vm1 = vcmask 228352   ;;  %v3000_v9 = vmov 0.0   ;;  %vm279_vm2 = vcmask 261120  }
   0x8   :  { %295 = vmatpush.msra.mxu1 %v3064_v2  ;;  %v3078_v5 = vld [vmem:[%s3760_s2 + $0x8] sm:$0xff]  ;;  %347 = vmatpush.msra.mxu3 %v3064_v2  ;;  %v77_v6 = vld [vmem:[%s3759_s1] sm:$0xff]  ;;  %v51_v17 = vld [vmem:[%s3758_s0 + $0x10] sm:$0xff]  ;;  %s3001_s16 = smov [#allocation6]   ;;  %s2671_s19 = sshll.u32 %s3767_s9, 4  ;;  %s2672_s19 = int_to_ptr.hbm [resolvable:$true] %s2671_s19 }
   0x9   :  { %477 = vmatpush.msra.mxu2 %v3064_v2  ;;  %191 = vmatpush.msra.mxu0 %v79_v1  ;;  %v3089_v7 = vld [vmem:[%s3760_s2] sm:$0xff]  ;;  %v50_v10 = vld [vmem:[%s3758_s0 + $0x8] sm:$0xff]  ;;  %v52_v23 = vld [vmem:[%s3758_s0 + $0x18] sm:$0xff]  ;;  %s2669_s17 = sshll.u32 %s3001_s16, 4  ;;  %s2670_s17 = int_to_ptr.vmem [resolvable:$true] %s2669_s17 }
   0xa   :  { %296 = vmatpush.msra.mxu1 %v3070_v3  ;;  %348 = vmatpush.msra.mxu3 %v3070_v3  ;;  %v49_v8 = vld [vmem:[%s3758_s0] sm:$0xff]  ;;  %v54_v35 = vld [vmem:[%s3758_s0 + $0x28] sm:$0xff]  ;;  %v55_v41 = vld [vmem:[%s3758_s0 + $0x30] sm:$0xff] }
   0xb   :  { %478 = vmatpush.msra.mxu2 %v3070_v3  ;;  %192 = vmatpush.msra.mxu0 %v78_v4  ;;  %v3127_v11 = vld [vmem:[%s3761_s3] ss:$0 sm:$0xff]  ;;  %v56_v47 = vld [vmem:[%s3758_s0 + $0x38] sm:$0xff]  ;;  %v58_v59 = vld [vmem:[%s3758_s0 + $0x48] sm:$0xff] }
   0xc   :  { %297 = vmatpush.msra.mxu1 %v3078_v5  ;;  %349 = vmatpush.msra.mxu3 %v3078_v5  ;;  %v53_v29 = vld [vmem:[%s3758_s0 + $0x20] sm:$0xff]  ;;  %v59_v1 = vld [vmem:[%s3758_s0 + $0x50] sm:$0xff] }
   0xd   :  { %479 = vmatpush.msra.mxu2 %v3078_v5  ;;  %193 = vmatpush.msra.mxu0 %v77_v6  ;;  %v57_v53 = vld [vmem:[%s3758_s0 + $0x40] sm:$0xff] }
   0xe   :  { %298 = vmatpush.msra.mxu1 %v3089_v7  ;;  %2682 = vmatmul.msk.f32.vlgmr.msra.gmra.mxu0 %vm89_vm1, %v49_v8 }
   0xf   :  { %299 = vmatmul.f32.vlgmr.msra.gmra.mxu1 %v3000_v9  ;;  %350 = vmatpush.msra.mxu3 %v3089_v7 }
  0x10   :  { %321 = vmatpush.msrb.mxu1 %v3064_v2  ;;  %480 = vmatpush.msra.mxu2 %v3089_v7 }
  0x11   :  { %399 = vmatpush.msrb.mxu3 %v3064_v2 }
  0x12   :  { %322 = vmatpush.msrb.mxu1 %v3070_v3  ;;  %555 = vmatpush.msrb.mxu2 %v3064_v2 }
  0x13   :  { %400 = vmatpush.msrb.mxu3 %v3070_v3 }
  0x14   :  { %323 = vmatpush.msrb.mxu1 %v3078_v5  ;;  %556 = vmatpush.msrb.mxu2 %v3070_v3 }
  0x15   :  { %401 = vmatpush.msrb.mxu3 %v3078_v5 }
  0x16   :  { %324 = vmatpush.msrb.mxu1 %v3089_v7  ;;  %557 = vmatpush.msrb.mxu2 %v3078_v5 }
  0x17   :  { %402 = vmatpush.msrb.mxu3 %v3089_v7  ;;  %2683 = vmatmul.msk.f32.gmra.mxu0 %vm89_vm1, %v50_v10 }
  0x18   :  { %373 = vmatpush.msra.mxu1 %v3064_v2  ;;  %558 = vmatpush.msrb.mxu2 %v3089_v7 }
  0x1a   :  { %374 = vmatpush.msra.mxu1 %v3070_v3 }
  0x1c   :  { %375 = vmatpush.msra.mxu1 %v3078_v5 }
  0x1e   :  { %376 = vmatpush.msra.mxu1 %v3089_v7 }
  0x1f   :  { %2684 = vmatmul.msk.f32.gmra.mxu0 %vm89_vm1, %v51_v17 }
  0x27   :  { %2685 = vmatmul.msk.f32.gmra.mxu0 %vm89_vm1, %v52_v23 }
  0x2f   :  { %2686 = vmatmul.msk.f32.gmra.mxu0 %vm89_vm1, %v53_v29 }
  0x37   :  { %2687 = vmatmul.msk.f32.gmra.mxu0 %vm89_vm1, %v54_v35 }
  0x3f   :  { %2688 = vmatmul.msk.f32.gmra.mxu0 %vm89_vm1, %v55_v41 }
  0x47   :  { %2689 = vmatmul.msk.f32.gmra.mxu0 %vm89_vm1, %v56_v47 }
  0x4f   :  { %2690 = vmatmul.msk.f32.gmra.mxu0 %vm89_vm1, %v57_v53 }
  0x57   :  { %2691 = vmatmul.msk.f32.gmra.mxu0 %vm89_vm1, %v58_v59 }
  0x5f   :  { %2692 = vmatmul.msk.f32.gmra.mxu0 %vm89_vm1, %v59_v1 }
  0x8b   :  { %v195_v12 = vpop.f32.mrf.mxu0 }
  0x8c   :  { %v300_v13 = vpop.f32.mrf.mxu1  ;;  %v196_v14 = vadd.f32 %v3127_v11, %v195_v12 }
  0x8e   :  { %v303_v15 = vadd.f32 %v300_v13, %v196_v14  ;;  %v60_v13 = vld [vmem:[%s3758_s0 + $0x58] sm:$0xff] }
  0x8f   :  { %2693 = vmatmul.msk.f32.gmra.mxu0 %vm89_vm1, %v60_v13 }
  0x90   :  { %2828 = vtanh.f32 %v303_v15 }
  0x94   :  { %v198_v18 = vpop.f32.mrf.mxu0 }
  0x95   :  { %v199_v19 = vadd.f32 %v3127_v11, %v198_v18 }
  0x96   :  { %v2829_v16 = vpop.eup %2828 }
  0x97   :  { %305 = vst.msk [vmem:[#allocation2] sm:$0xff] %vm279_vm2, %v2829_v16  ;;  %2710 = vmatmul.msk.f32.vlgmr.msrb.gmra.mxu1 %vm279_vm2, %v2829_v16 }
  0x98   :  { %451 = vmatpush.msrb.mxu1 %v3064_v2 }
  0x9a   :  { %452 = vmatpush.msrb.mxu1 %v3070_v3 }
  0x9c   :  { %453 = vmatpush.msrb.mxu1 %v3078_v5  ;;  %v201_v24 = vpop.f32.mrf.mxu0 }
  0x9d   :  { %v202_v25 = vadd.f32 %v3127_v11, %v201_v24 }
  0x9e   :  { %454 = vmatpush.msrb.mxu1 %v3089_v7 }
  0xa4   :  { %v204_v30 = vpop.f32.mrf.mxu0 }
  0xa5   :  { %v205_v31 = vadd.f32 %v3127_v11, %v204_v30 }
  0xac   :  { %v207_v36 = vpop.f32.mrf.mxu0 }
  0xad   :  { %v208_v37 = vadd.f32 %v3127_v11, %v207_v36 }
  0xb4   :  { %v210_v42 = vpop.f32.mrf.mxu0 }
  0xb5   :  { %v211_v43 = vadd.f32 %v3127_v11, %v210_v42 }
  0xbc   :  { %v213_v48 = vpop.f32.mrf.mxu0 }
  0xbd   :  { %v214_v49 = vadd.f32 %v3127_v11, %v213_v48 }
  0xc4   :  { %v216_v54 = vpop.f32.mrf.mxu0 }
  0xc5   :  { %v217_v55 = vadd.f32 %v3127_v11, %v216_v54 }
  0xcc   :  { %v219_v60 = vpop.f32.mrf.mxu0 }
  0xcd   :  { %v220_v61 = vadd.f32 %v3127_v11, %v219_v60 }
  0xd4   :  { %v222_v4 = vpop.f32.mrf.mxu0 }
  0xd5   :  { %v223_v6 = vadd.f32 %v3127_v11, %v222_v4 }
  0xdc   :  { %v225_v14 = vpop.f32.mrf.mxu0 }
  0xdd   :  { %v226_v15 = vadd.f32 %v3127_v11, %v225_v14 }
 0x114   :  { %v326_v20 = vpop.f32.mrf.mxu1 }
 0x115   :  { %v329_v21 = vadd.f32 %v326_v20, %v199_v19  ;;  %v61_v19 = vld [vmem:[%s3758_s0 + $0x60] sm:$0xff]  ;;  %v228_v20 = vpop.f32.mrf.mxu0 }
 0x116   :  { %2694 = vmatmul.msk.f32.gmra.mxu0 %vm89_vm1, %v61_v19 }
 0x117   :  { %2830 = vtanh.f32 %v329_v21  ;;  %v229_v21 = vadd.f32 %v3127_v11, %v228_v20 }
 0x11d   :  { %v2831_v22 = vpop.eup %2830 }
 0x11e   :  { %331 = vst.msk [vmem:[#allocation2 + $0x8] sm:$0xff] %vm279_vm2, %v2831_v22  ;;  %2711 = vmatmul.msk.f32.vlgmr.msra.gmra.mxu3 %vm279_vm2, %v2831_v22 }
 0x11f   :  { %425 = vmatpush.msra.mxu3 %v3064_v2 }
 0x121   :  { %426 = vmatpush.msra.mxu3 %v3070_v3 }
 0x123   :  { %427 = vmatpush.msra.mxu3 %v3078_v5 }
 0x125   :  { %428 = vmatpush.msra.mxu3 %v3089_v7 }
 0x1a1   :  { %v352_v26 = vpop.f32.mrf.mxu3 }
 0x1a2   :  { %v355_v27 = vadd.f32 %v352_v26, %v202_v25  ;;  %v62_v25 = vld [vmem:[%s3758_s0 + $0x68] sm:$0xff]  ;;  %v231_v26 = vpop.f32.mrf.mxu0 }
 0x1a3   :  { %2695 = vmatmul.msk.f32.gmra.mxu0 %vm89_vm1, %v62_v25 }
 0x1a4   :  { %2832 = vtanh.f32 %v355_v27  ;;  %v232_v27 = vadd.f32 %v3127_v11, %v231_v26 }
 0x1aa   :  { %v2833_v28 = vpop.eup %2832 }
 0x1ab   :  { %357 = vst.msk [vmem:[#allocation2 + $0x10] sm:$0xff] %vm279_vm2, %v2833_v28  ;;  %2712 = vmatmul.msk.f32.vlgmr.msra.gmra.mxu1 %vm279_vm2, %v2833_v28 }
 0x1ac   :  { %529 = vmatpush.msra.mxu1 %v3064_v2 }
 0x1ae   :  { %530 = vmatpush.msra.mxu1 %v3070_v3 }
 0x1b0   :  { %531 = vmatpush.msra.mxu1 %v3078_v5 }
 0x1b2   :  { %532 = vmatpush.msra.mxu1 %v3089_v7 }
 0x228   :  { %v378_v32 = vpop.f32.mrf.mxu1 }
 0x229   :  { %v381_v33 = vadd.f32 %v378_v32, %v205_v31  ;;  %v63_v31 = vld [vmem:[%s3758_s0 + $0x70] sm:$0xff]  ;;  %v234_v32 = vpop.f32.mrf.mxu0 }
 0x22a   :  { %2696 = vmatmul.msk.f32.gmra.mxu0 %vm89_vm1, %v63_v31 }
 0x22b   :  { %2834 = vtanh.f32 %v381_v33  ;;  %v235_v33 = vadd.f32 %v3127_v11, %v234_v32 }
 0x231   :  { %v2835_v34 = vpop.eup %2834 }
 0x232   :  { %383 = vst.msk [vmem:[#allocation2 + $0x18] sm:$0xff] %vm279_vm2, %v2835_v34  ;;  %2713 = vmatmul.msk.f32.vlgmr.msrb.gmra.mxu3 %vm279_vm2, %v2835_v34 }
 0x233   :  { %503 = vmatpush.msrb.mxu3 %v3064_v2 }
 0x235   :  { %504 = vmatpush.msrb.mxu3 %v3070_v3 }
 0x237   :  { %505 = vmatpush.msrb.mxu3 %v3078_v5 }
 0x239   :  { %506 = vmatpush.msrb.mxu3 %v3089_v7 }
 0x2b5   :  { %v404_v38 = vpop.f32.mrf.mxu3 }
 0x2b6   :  { %v407_v39 = vadd.f32 %v404_v38, %v208_v37  ;;  %v64_v37 = vld [vmem:[%s3758_s0 + $0x78] sm:$0xff]  ;;  %v237_v38 = vpop.f32.mrf.mxu0 }
 0x2b7   :  { %2697 = vmatmul.msk.f32.gmra.mxu0 %vm89_vm1, %v64_v37  ;;  %v74_v37 = vld [vmem:[%s3758_s0 + $0xc8] sm:$0xff] }
 0x2b8   :  { %2836 = vtanh.f32 %v407_v39  ;;  %v238_v39 = vadd.f32 %v3127_v11, %v237_v38  ;;  %v1037_v38 = vld [vmem:[%s3762_s4 + $0x8] sm:$0xff] }
 0x2be   :  { %v2837_v40 = vpop.eup %2836 }
 0x2bf   :  { %409 = vst.msk [vmem:[#allocation2 + $0x20] sm:$0xff] %vm279_vm2, %v2837_v40  ;;  %2714 = vmatmul.msk.f32.vlgmr.msra.gmra.mxu3 %vm279_vm2, %v2837_v40 }
 0x2c0   :  { %581 = vmatpush.msra.mxu3 %v3064_v2 }
 0x2c2   :  { %582 = vmatpush.msra.mxu3 %v3070_v3 }
 0x2c4   :  { %583 = vmatpush.msra.mxu3 %v3078_v5 }
 0x2c6   :  { %584 = vmatpush.msra.mxu3 %v3089_v7 }
 0x342   :  { %v430_v44 = vpop.f32.mrf.mxu3 }
 0x343   :  { %v433_v45 = vadd.f32 %v430_v44, %v211_v43  ;;  %v65_v43 = vld [vmem:[%s3758_s0 + $0x80] sm:$0xff]  ;;  %v240_v44 = vpop.f32.mrf.mxu0 }
 0x344   :  { %2698 = vmatmul.msk.f32.gmra.mxu0 %vm89_vm1, %v65_v43 }
 0x345   :  { %2838 = vtanh.f32 %v433_v45  ;;  %v241_v45 = vadd.f32 %v3127_v11, %v240_v44 }
 0x34b   :  { %v2839_v46 = vpop.eup %2838 }
 0x34c   :  { %435 = vst.msk [vmem:[#allocation2 + $0x28] sm:$0xff] %vm279_vm2, %v2839_v46  ;;  %2715 = vmatmul.msk.f32.vlgmr.msrb.gmra.mxu1 %vm279_vm2, %v2839_v46 }
 0x34d   :  { %607 = vmatpush.msrb.mxu1 %v3064_v2 }
 0x34f   :  { %608 = vmatpush.msrb.mxu1 %v3070_v3 }
 0x351   :  { %609 = vmatpush.msrb.mxu1 %v3078_v5 }
 0x353   :  { %610 = vmatpush.msrb.mxu1 %v3089_v7 }
 0x3c9   :  { %v456_v50 = vpop.f32.mrf.mxu1 }
 0x3ca   :  { %v459_v51 = vadd.f32 %v456_v50, %v214_v49  ;;  %v66_v49 = vld [vmem:[%s3758_s0 + $0x88] sm:$0xff]  ;;  %v243_v50 = vpop.f32.mrf.mxu0 }
 0x3cb   :  { %2699 = vmatmul.msk.f32.gmra.mxu0 %vm89_vm1, %v66_v49  ;;  %v1012_v49 = vld [vmem:[#allocation2 + $0x20] sm:$0xff] }
 0x3cc   :  { %2840 = vtanh.f32 %v459_v51  ;;  %v244_v51 = vadd.f32 %v3127_v11, %v243_v50  ;;  %v1013_v50 = vld [vmem:[#allocation2 + $0x28] sm:$0xff] }
 0x3d2   :  { %v2841_v52 = vpop.eup %2840 }
 0x3d3   :  { %461 = vst.msk [vmem:[#allocation2 + $0x30] sm:$0xff] %vm279_vm2, %v2841_v52  ;;  %2716 = vmatmul.msk.f32.vlgmr.msra.gmra.mxu2 %vm279_vm2, %v2841_v52 }
 0x3d4   :  { %633 = vmatpush.msra.mxu2 %v3064_v2 }
 0x3d6   :  { %634 = vmatpush.msra.mxu2 %v3070_v3 }
 0x3d8   :  { %635 = vmatpush.msra.mxu2 %v3078_v5 }
 0x3da   :  { %636 = vmatpush.msra.mxu2 %v3089_v7 }
 0x456   :  { %v482_v56 = vpop.f32.mrf.mxu2 }
 0x457   :  { %v485_v57 = vadd.f32 %v482_v56, %v217_v55  ;;  %v67_v55 = vld [vmem:[%s3758_s0 + $0x90] sm:$0xff]  ;;  %v246_v56 = vpop.f32.mrf.mxu0 }
 0x458   :  { %2700 = vmatmul.msk.f32.gmra.mxu0 %vm89_vm1, %v67_v55 }
 0x459   :  { %2842 = vtanh.f32 %v485_v57  ;;  %v247_v57 = vadd.f32 %v3127_v11, %v246_v56 }
 0x45f   :  { %v2843_v58 = vpop.eup %2842 }
 0x460   :  { %487 = vst.msk [vmem:[#allocation2 + $0x38] sm:$0xff] %vm279_vm2, %v2843_v58  ;;  %2717 = vmatmul.msk.f32.vlgmr.msrb.gmra.mxu3 %vm279_vm2, %v2843_v58 }
 0x461   :  { %659 = vmatpush.msrb.mxu3 %v3064_v2 }
 0x463   :  { %660 = vmatpush.msrb.mxu3 %v3070_v3 }
 0x465   :  { %661 = vmatpush.msrb.mxu3 %v3078_v5 }
 0x467   :  { %662 = vmatpush.msrb.mxu3 %v3089_v7 }
 0x4e3   :  { %v508_v62 = vpop.f32.mrf.mxu3 }
 0x4e4   :  { %v511_v63 = vadd.f32 %v508_v62, %v220_v61  ;;  %v68_v61 = vld [vmem:[%s3758_s0 + $0x98] sm:$0xff]  ;;  %v249_v62 = vpop.f32.mrf.mxu0 }
 0x4e5   :  { %2701 = vmatmul.msk.f32.gmra.mxu0 %vm89_vm1, %v68_v61  ;;  %v75_v61 = vld [vmem:[%s3758_s0 + $0xd0] sm:$0xff] }
 0x4e6   :  { %2844 = vtanh.f32 %v511_v63  ;;  %v250_v63 = vadd.f32 %v3127_v11, %v249_v62  ;;  %v3429_v62 = vld [vmem:[%s3763_s5 + $0x8] sm:$0xff] }
 0x4ec   :  { %v2845_v0 = vpop.eup %2844 }
 0x4ed   :  { %513 = vst.msk [vmem:[#allocation2 + $0x40] sm:$0xff] %vm279_vm2, %v2845_v0  ;;  %2718 = vmatmul.msk.f32.vlgmr.msra.gmra.mxu1 %vm279_vm2, %v2845_v0 }
 0x4ee   :  { %685 = vmatpush.msra.mxu1 %v3064_v2 }
 0x4f0   :  { %686 = vmatpush.msra.mxu1 %v3070_v3 }
 0x4f2   :  { %687 = vmatpush.msra.mxu1 %v3078_v5 }
 0x4f4   :  { %688 = vmatpush.msra.mxu1 %v3089_v7 }
 0x56a   :  { %v534_v8 = vpop.f32.mrf.mxu1 }
 0x56b   :  { %v537_v10 = vadd.f32 %v534_v8, %v223_v6  ;;  %v69_v6 = vld [vmem:[%s3758_s0 + $0xa0] sm:$0xff]  ;;  %v252_v8 = vpop.f32.mrf.mxu0 }
 0x56c   :  { %2702 = vmatmul.msk.f32.gmra.mxu0 %vm89_vm1, %v69_v6 }
 0x56d   :  { %2846 = vtanh.f32 %v537_v10  ;;  %v253_v10 = vadd.f32 %v3127_v11, %v252_v8 }
 0x573   :  { %v2847_v12 = vpop.eup %2846 }
 0x574   :  { %539 = vst.msk [vmem:[#allocation2 + $0x48] sm:$0xff] %vm279_vm2, %v2847_v12  ;;  %2719 = vmatmul.msk.f32.vlgmr.msrb.gmra.mxu2 %vm279_vm2, %v2847_v12 }
 0x575   :  { %711 = vmatpush.msrb.mxu2 %v3064_v2 }
 0x577   :  { %712 = vmatpush.msrb.mxu2 %v3070_v3 }
 0x579   :  { %713 = vmatpush.msrb.mxu2 %v3078_v5 }
 0x57b   :  { %714 = vmatpush.msrb.mxu2 %v3089_v7 }
 0x5f7   :  { %v560_v16 = vpop.f32.mrf.mxu2 }
 0x5f8   :  { %v563_v17 = vadd.f32 %v560_v16, %v226_v15  ;;  %v70_v15 = vld [vmem:[%s3758_s0 + $0xa8] sm:$0xff]  ;;  %v255_v16 = vpop.f32.mrf.mxu0 }
 0x5f9   :  { %2703 = vmatmul.msk.f32.gmra.mxu0 %vm89_vm1, %v70_v15 }
 0x5fa   :  { %2848 = vtanh.f32 %v563_v17  ;;  %v256_v17 = vadd.f32 %v3127_v11, %v255_v16 }
 0x600   :  { %v2849_v18 = vpop.eup %2848 }
 0x601   :  { %565 = vst.msk [vmem:[#allocation2 + $0x50] sm:$0xff] %vm279_vm2, %v2849_v18  ;;  %2720 = vmatmul.msk.f32.vlgmr.msra.gmra.mxu3 %vm279_vm2, %v2849_v18 }
 0x602   :  { %737 = vmatpush.msra.mxu3 %v3064_v2 }
 0x604   :  { %738 = vmatpush.msra.mxu3 %v3070_v3 }
 0x606   :  { %739 = vmatpush.msra.mxu3 %v3078_v5 }
 0x608   :  { %740 = vmatpush.msra.mxu3 %v3089_v7  ;;  %v1018_v55 = vld [vmem:[#allocation2 + $0x50] sm:$0xff] }
 0x684   :  { %v586_v22 = vpop.f32.mrf.mxu3 }
 0x685   :  { %v589_v23 = vadd.f32 %v586_v22, %v229_v21  ;;  %v71_v21 = vld [vmem:[%s3758_s0 + $0xb0] sm:$0xff]  ;;  %v258_v22 = vpop.f32.mrf.mxu0 }
 0x686   :  { %2704 = vmatmul.msk.f32.gmra.mxu0 %vm89_vm1, %v71_v21 }
 0x687   :  { %2850 = vtanh.f32 %v589_v23  ;;  %v259_v23 = vadd.f32 %v3127_v11, %v258_v22 }
 0x68d   :  { %v2851_v24 = vpop.eup %2850 }
 0x68e   :  { %591 = vst.msk [vmem:[#allocation2 + $0x58] sm:$0xff] %vm279_vm2, %v2851_v24  ;;  %2721 = vmatmul.msk.f32.vlgmr.msrb.gmra.mxu1 %vm279_vm2, %v2851_v24 }
 0x68f   :  { %763 = vmatpush.msrb.mxu1 %v3064_v2 }
 0x691   :  { %764 = vmatpush.msrb.mxu1 %v3070_v3 }
 0x693   :  { %765 = vmatpush.msrb.mxu1 %v3078_v5 }
 0x695   :  { %766 = vmatpush.msrb.mxu1 %v3089_v7  ;;  %v1019_v56 = vld [vmem:[#allocation2 + $0x58] sm:$0xff] }
 0x70b   :  { %v612_v28 = vpop.f32.mrf.mxu1 }
 0x70c   :  { %v615_v29 = vadd.f32 %v612_v28, %v232_v27 }
 0x70e   :  { %2852 = vtanh.f32 %v615_v29  ;;  %v73_v29 = vld [vmem:[%s3758_s0 + $0xc0] sm:$0xff] }
 0x714   :  { %v2853_v30 = vpop.eup %2852 }
 0x715   :  { %617 = vst.msk [vmem:[#allocation2 + $0x60] sm:$0xff] %vm279_vm2, %v2853_v30  ;;  %2722 = vmatmul.msk.f32.vlgmr.msra.gmra.mxu2 %vm279_vm2, %v2853_v30 }
 0x716   :  { %789 = vmatpush.msra.mxu2 %v3064_v2 }
 0x718   :  { %790 = vmatpush.msra.mxu2 %v3070_v3 }
 0x71a   :  { %791 = vmatpush.msra.mxu2 %v3078_v5 }
 0x71c   :  { %792 = vmatpush.msra.mxu2 %v3089_v7 }
 0x798   :  { %v638_v34 = vpop.f32.mrf.mxu2 }
 0x799   :  { %v641_v35 = vadd.f32 %v638_v34, %v235_v33 }
 0x79b   :  { %2854 = vtanh.f32 %v641_v35  ;;  %v1039_v35 = vld [vmem:[%s3762_s4 + $0x18] sm:$0xff] }
 0x7a1   :  { %v2855_v36 = vpop.eup %2854 }
 0x7a2   :  { %643 = vst.msk [vmem:[#allocation2 + $0x68] sm:$0xff] %vm279_vm2, %v2855_v36  ;;  %2723 = vmatmul.msk.f32.vlgmr.msrb.gmra.mxu3 %vm279_vm2, %v2855_v36  ;;  %v1038_v36 = vld [vmem:[%s3762_s4 + $0x10] sm:$0xff] }
 0x7a3   :  { %815 = vmatpush.msrb.mxu3 %v3064_v2 }
 0x7a5   :  { %816 = vmatpush.msrb.mxu3 %v3070_v3 }
 0x7a7   :  { %817 = vmatpush.msrb.mxu3 %v3078_v5 }
 0x7a9   :  { %818 = vmatpush.msrb.mxu3 %v3089_v7 }
 0x825   :  { %v664_v40 = vpop.f32.mrf.mxu3 }
 0x826   :  { %v667_v41 = vadd.f32 %v664_v40, %v238_v39  ;;  %v1036_v39 = vld [vmem:[%s3762_s4] sm:$0xff] }
 0x828   :  { %2856 = vtanh.f32 %v667_v41 }
 0x82e   :  { %v2857_v42 = vpop.eup %2856 }
 0x82f   :  { %669 = vst.msk [vmem:[#allocation2 + $0x70] sm:$0xff] %vm279_vm2, %v2857_v42  ;;  %2724 = vmatmul.msk.f32.vlgmr.msra.gmra.mxu1 %vm279_vm2, %v2857_v42 }
 0x830   :  { %841 = vmatpush.msra.mxu1 %v3064_v2 }
 0x832   :  { %842 = vmatpush.msra.mxu1 %v3070_v3 }
 0x834   :  { %843 = vmatpush.msra.mxu1 %v3078_v5 }
 0x836   :  { %844 = vmatpush.msra.mxu1 %v3089_v7 }
 0x8ac   :  { %v690_v46 = vpop.f32.mrf.mxu1 }
 0x8ad   :  { %v693_v47 = vadd.f32 %v690_v46, %v241_v45  ;;  %v1008_v45 = vld [vmem:[#allocation2] sm:$0xff]  ;;  %v1009_v46 = vld [vmem:[#allocation2 + $0x8] sm:$0xff] }
 0x8af   :  { %2858 = vtanh.f32 %v693_v47  ;;  %v1010_v47 = vld [vmem:[#allocation2 + $0x10] sm:$0xff] }
 0x8b5   :  { %v2859_v48 = vpop.eup %2858 }
 0x8b6   :  { %695 = vst.msk [vmem:[#allocation2 + $0x78] sm:$0xff] %vm279_vm2, %v2859_v48  ;;  %2725 = vmatmul.msk.f32.vlgmr.msrb.gmra.mxu2 %vm279_vm2, %v2859_v48  ;;  %v1011_v48 = vld [vmem:[#allocation2 + $0x18] sm:$0xff] }
 0x8b7   :  { %867 = vmatpush.msrb.mxu2 %v3064_v2 }
 0x8b9   :  { %868 = vmatpush.msrb.mxu2 %v3070_v3 }
 0x8bb   :  { %869 = vmatpush.msrb.mxu2 %v3078_v5 }
 0x8bd   :  { %870 = vmatpush.msrb.mxu2 %v3089_v7 }
 0x939   :  { %v716_v52 = vpop.f32.mrf.mxu2 }
 0x93a   :  { %v719_v53 = vadd.f32 %v716_v52, %v244_v51  ;;  %v1014_v51 = vld [vmem:[#allocation2 + $0x30] sm:$0xff]  ;;  %v1015_v52 = vld [vmem:[#allocation2 + $0x38] sm:$0xff] }
 0x93c   :  { %2860 = vtanh.f32 %v719_v53  ;;  %v1016_v53 = vld [vmem:[#allocation2 + $0x40] sm:$0xff] }
 0x942   :  { %v2861_v54 = vpop.eup %2860 }
 0x943   :  { %721 = vst.msk [vmem:[#allocation2 + $0x80] sm:$0xff] %vm279_vm2, %v2861_v54  ;;  %2726 = vmatmul.msk.f32.vlgmr.msra.gmra.mxu3 %vm279_vm2, %v2861_v54  ;;  %v1017_v54 = vld [vmem:[#allocation2 + $0x48] sm:$0xff] }
 0x944   :  { %893 = vmatpush.msra.mxu3 %v3064_v2 }
 0x946   :  { %894 = vmatpush.msra.mxu3 %v3070_v3 }
 0x948   :  { %895 = vmatpush.msra.mxu3 %v3078_v5 }
 0x94a   :  { %896 = vmatpush.msra.mxu3 %v3089_v7 }
 0x9c6   :  { %v742_v58 = vpop.f32.mrf.mxu3 }
 0x9c7   :  { %v745_v59 = vadd.f32 %v742_v58, %v247_v57  ;;  %v1020_v57 = vld [vmem:[#allocation2 + $0x60] sm:$0xff]  ;;  %v3412_v58 = vld [vmem:[%s3763_s5 + $0x18] sm:$0xff] }
 0x9c9   :  { %2862 = vtanh.f32 %v745_v59  ;;  %v3417_v59 = vld [vmem:[%s3763_s5 + $0x10] sm:$0xff] }
 0x9cf   :  { %v2863_v60 = vpop.eup %2862 }
 0x9d0   :  { %747 = vst.msk [vmem:[#allocation2 + $0x88] sm:$0xff] %vm279_vm2, %v2863_v60  ;;  %2727 = vmatmul.msk.f32.vlgmr.msrb.gmra.mxu1 %vm279_vm2, %v2863_v60  ;;  %v1021_v60 = vld [vmem:[#allocation2 + $0x68] sm:$0xff] }
 0x9d1   :  { %919 = vmatpush.msrb.mxu1 %v3064_v2 }
 0x9d3   :  { %920 = vmatpush.msrb.mxu1 %v3070_v3 }
 0x9d5   :  { %921 = vmatpush.msrb.mxu1 %v3078_v5 }
 0x9d7   :  { %922 = vmatpush.msrb.mxu1 %v3089_v7 }
 0xa4d   :  { %v768_v0 = vpop.f32.mrf.mxu1 }
 0xa4e   :  { %v771_v1 = vadd.f32 %v768_v0, %v250_v63  ;;  %v3437_v63 = vld [vmem:[%s3763_s5] sm:$0xff]  ;;  %v1022_v0 = vld [vmem:[#allocation2 + $0x70] sm:$0xff] }
 0xa50   :  { %2864 = vtanh.f32 %v771_v1 }
 0xa56   :  { %v2865_v4 = vpop.eup %2864 }
 0xa57   :  { %773 = vst.msk [vmem:[#allocation2 + $0x90] sm:$0xff] %vm279_vm2, %v2865_v4  ;;  %2728 = vmatmul.msk.f32.vlgmr.msra.gmra.mxu2 %vm279_vm2, %v2865_v4  ;;  %v1023_v4 = vld [vmem:[#allocation2 + $0x78] sm:$0xff] }
 0xa58   :  { %945 = vmatpush.msra.mxu2 %v3064_v2 }
 0xa5a   :  { %946 = vmatpush.msra.mxu2 %v3070_v3 }
 0xa5c   :  { %947 = vmatpush.msra.mxu2 %v3078_v5 }
 0xa5e   :  { %948 = vmatpush.msra.mxu2 %v3089_v7  ;;  %v1026_v15 = vld [vmem:[#allocation2 + $0x90] sm:$0xff] }
 0xada   :  { %v794_v12 = vpop.f32.mrf.mxu2 }
 0xadb   :  { %v797_v13 = vadd.f32 %v794_v12, %v253_v10  ;;  %v1024_v12 = vld [vmem:[#allocation2 + $0x80] sm:$0xff] }
 0xadd   :  { %2866 = vtanh.f32 %v797_v13 }
 0xae3   :  { %v2867_v14 = vpop.eup %2866 }
 0xae4   :  { %799 = vst.msk [vmem:[#allocation2 + $0x98] sm:$0xff] %vm279_vm2, %v2867_v14  ;;  %2729 = vmatmul.msk.f32.vlgmr.msrb.gmra.mxu3 %vm279_vm2, %v2867_v14  ;;  %v1025_v14 = vld [vmem:[#allocation2 + $0x88] sm:$0xff] }
 0xae5   :  { %971 = vmatpush.msrb.mxu3 %v3064_v2 }
 0xae7   :  { %972 = vmatpush.msrb.mxu3 %v3070_v3 }
 0xae9   :  { %973 = vmatpush.msrb.mxu3 %v3078_v5 }
 0xaeb   :  { %974 = vmatpush.msrb.mxu3 %v3089_v7  ;;  %v1027_v16 = vld [vmem:[#allocation2 + $0x98] sm:$0xff] }
 0xb67   :  { %v820_v18 = vpop.f32.mrf.mxu3 }
 0xb68   :  { %v823_v19 = vadd.f32 %v820_v18, %v256_v17 }
 0xb6a   :  { %2868 = vtanh.f32 %v823_v19 }
 0xb70   :  { %v2869_v20 = vpop.eup %2868 }
 0xb71   :  { %825 = vst.msk [vmem:[#allocation2 + $0xa0] sm:$0xff] %vm279_vm2, %v2869_v20  ;;  %2730 = vmatmul.msk.f32.vlgmr.msra.gmra.mxu1 %vm279_vm2, %v2869_v20 }
 0xb72   :  { %997 = vmatpush.msra.mxu1 %v3064_v2  ;;  %v72_v2 = vld [vmem:[%s3758_s0 + $0xb8] sm:$0xff] }
 0xb73   :  { %2705 = vmatmul.msk.f32.gmra.mxu0 %vm89_vm1, %v72_v2 }
 0xb74   :  { %998 = vmatpush.msra.mxu1 %v3070_v3  ;;  %v261_v3 = vpop.f32.mrf.mxu0 }
 0xb76   :  { %999 = vmatpush.msra.mxu1 %v3078_v5  ;;  %v262_v5 = vadd.f32 %v3127_v11, %v261_v3 }
 0xb78   :  { %1000 = vmatpush.msra.mxu1 %v3089_v7  ;;  %v1028_v17 = vld [vmem:[#allocation2 + $0xa0] sm:$0xff] }
 0xb7b   :  { %2706 = vmatmul.msk.f32.gmra.mxu0 %vm89_vm1, %v73_v29 }
 0xb83   :  { %2707 = vmatmul.msk.f32.gmra.mxu0 %vm89_vm1, %v74_v37  ;;  %v1289_v37 = vld [vmem:[#allocation3 + $0x38] sm:$0xff] }
 0xb8b   :  { %2708 = vmatmul.msk.f32.gmra.mxu0 %vm89_vm1, %v75_v61 }
 0xbee   :  { %v846_v24 = vpop.f32.mrf.mxu1 }
 0xbef   :  { %v849_v25 = vadd.f32 %v846_v24, %v259_v23  ;;  %v76_v24 = vld [vmem:[%s3758_s0 + $0xd8] sm:$0xff] }
 0xbf0   :  { %v264_v30 = vpop.f32.mrf.mxu0  ;;  %2709 = vmatmul.msk.f32.gmra.mxu0 %vm89_vm1, %v76_v24  ;;  %v1510_v24 = vld [vmem:[#allocation3 + $0xa8] sm:$0xff] }
 0xbf1   :  { %2870 = vtanh.f32 %v849_v25  ;;  %v265_v31 = vadd.f32 %v3127_v11, %v264_v30 }
 0xbf7   :  { %v2871_v26 = vpop.eup %2870 }
 0xbf8   :  { %851 = vst.msk [vmem:[#allocation2 + $0xa8] sm:$0xff] %vm279_vm2, %v2871_v26  ;;  %2731 = vmatmul.msk.f32.vlgmr.msrb.gmra.mxu2 %vm279_vm2, %v2871_v26  ;;  %v267_v40 = vpop.f32.mrf.mxu0 }
 0xbf9   :  { %1144 = vmatpush.msrb.mxu2 %v1039_v35  ;;  %v268_v41 = vadd.f32 %v3127_v11, %v267_v40  ;;  %v1286_v40 = vld [vmem:[#allocation3 + $0x20] sm:$0xff] }
 0xbfb   :  { %1145 = vmatpush.msrb.mxu2 %v1038_v36 }
 0xbfd   :  { %1146 = vmatpush.msrb.mxu2 %v1037_v38  ;;  %v1288_v38 = vld [vmem:[#allocation3 + $0x30] sm:$0xff] }
 0xbff   :  { %1147 = vmatpush.msrb.mxu2 %v1036_v39  ;;  %v1029_v18 = vld [vmem:[#allocation2 + $0xa8] sm:$0xff] }
 0xc00   :  { %v270_v1 = vpop.f32.mrf.mxu0  ;;  %v1287_v39 = vld [vmem:[#allocation3 + $0x28] sm:$0xff] }
 0xc01   :  { %v271_v6 = vadd.f32 %v3127_v11, %v270_v1  ;;  %v1409_v1 = vld [vmem:[#allocation3 + $0x70] sm:$0xff] }
 0xc08   :  { %v273_v25 = vpop.f32.mrf.mxu0 }
 0xc09   :  { %v274_v26 = vadd.f32 %v3127_v11, %v273_v25  ;;  %v1509_v25 = vld [vmem:[#allocation3 + $0xa0] sm:$0xff] }
 0xc7b   :  { %v872_v7 = vpop.f32.mrf.mxu2 }
 0xc7c   :  { %v875_v27 = vadd.f32 %v872_v7, %v262_v5  ;;  %v3466_v5 = vld [vmem:[%s3764_s6] ss:$0 sm:$0xff] }
 0xc7e   :  { %2872 = vtanh.f32 %v875_v27 }
 0xc84   :  { %v2873_v28 = vpop.eup %2872 }
 0xc85   :  { %877 = vst.msk [vmem:[#allocation2 + $0xb0] sm:$0xff] %vm279_vm2, %v2873_v28  ;;  %2732 = vmatmul.msk.f32.vlgmr.msra.gmra.mxu3 %vm279_vm2, %v2873_v28  ;;  %v1259_v28 = vld [vmem:[#allocation3 + $0x18] sm:$0xff] }
 0xc86   :  { %1246 = vmatpush.msra.mxu3 %v3412_v58 }
 0xc88   :  { %1247 = vmatpush.msra.mxu3 %v3417_v59 }
 0xc8a   :  { %1248 = vmatpush.msra.mxu3 %v3429_v62 }
 0xc8c   :  { %1249 = vmatpush.msra.mxu3 %v3437_v63  ;;  %v1030_v19 = vld [vmem:[#allocation2 + $0xb0] sm:$0xff] }
 0xd08   :  { %v898_v32 = vpop.f32.mrf.mxu3 }
 0xd09   :  { %v901_v33 = vadd.f32 %v898_v32, %v265_v31  ;;  %v1258_v31 = vld [vmem:[#allocation3 + $0x10] sm:$0xff]  ;;  %v1257_v32 = vld [vmem:[#allocation3 + $0x8] sm:$0xff] }
 0xd0b   :  { %2874 = vtanh.f32 %v901_v33  ;;  %v1256_v33 = vld [vmem:[#allocation3] sm:$0xff] }
 0xd11   :  { %v2875_v34 = vpop.eup %2874 }
 0xd12   :  { %903 = vst.msk [vmem:[#allocation2 + $0xb8] sm:$0xff] %vm279_vm2, %v2875_v34  ;;  %2733 = vmatmul.msk.f32.vlgmr.msrb.gmra.mxu1 %vm279_vm2, %v2875_v34 }
 0xd13   :  { %1275 = vmatpush.msrb.mxu1 %v3412_v58 }
 0xd15   :  { %1276 = vmatpush.msrb.mxu1 %v3417_v59 }
 0xd17   :  { %1277 = vmatpush.msrb.mxu1 %v3429_v62 }
 0xd19   :  { %1278 = vmatpush.msrb.mxu1 %v3437_v63  ;;  %v1031_v20 = vld [vmem:[#allocation2 + $0xb8] sm:$0xff] }
 0xd8f   :  { %v924_v42 = vpop.f32.mrf.mxu1 }
 0xd90   :  { %v927_v43 = vadd.f32 %v924_v42, %v268_v41  ;;  %v276_v41 = vpop.f32.mrf.mxu0 }
 0xd91   :  { %v277_v42 = vadd.f32 %v3127_v11, %v276_v41  ;;  %v1359_v11 = vld [vmem:[#allocation3 + $0x58] sm:$0xff] }
 0xd92   :  { %2876 = vtanh.f32 %v927_v43 }
 0xd98   :  { %v2877_v44 = vpop.eup %2876 }
 0xd99   :  { %929 = vst.msk [vmem:[#allocation2 + $0xc0] sm:$0xff] %vm279_vm2, %v2877_v44  ;;  %2734 = vmatmul.msk.f32.vlgmr.msra.gmra.mxu2 %vm279_vm2, %v2877_v44 }
 0xda1   :  { %2737 = vmatmul.msk.f32.vlgmr.msrb.gmra.mxu2 %vm279_vm2, %v1008_v45 }
 0xda9   :  { %2738 = vmatmul.msk.f32.gmra.mxu2 %vm279_vm2, %v1009_v46 }
 0xdb1   :  { %2739 = vmatmul.msk.f32.gmra.mxu2 %vm279_vm2, %v1010_v47 }
 0xdb9   :  { %2740 = vmatmul.msk.f32.gmra.mxu2 %vm279_vm2, %v1011_v48 }
 0xdc1   :  { %2741 = vmatmul.msk.f32.gmra.mxu2 %vm279_vm2, %v1012_v49 }
 0xdc9   :  { %2742 = vmatmul.msk.f32.gmra.mxu2 %vm279_vm2, %v1013_v50 }
 0xdd1   :  { %2743 = vmatmul.msk.f32.gmra.mxu2 %vm279_vm2, %v1014_v51 }
 0xdd9   :  { %2744 = vmatmul.msk.f32.gmra.mxu2 %vm279_vm2, %v1015_v52  ;;  %v1358_v52 = vld [vmem:[#allocation3 + $0x50] sm:$0xff] }
 0xde1   :  { %2745 = vmatmul.msk.f32.gmra.mxu2 %vm279_vm2, %v1016_v53  ;;  %v1357_v53 = vld [vmem:[#allocation3 + $0x48] sm:$0xff] }
 0xde9   :  { %2746 = vmatmul.msk.f32.gmra.mxu2 %vm279_vm2, %v1017_v54  ;;  %v1356_v54 = vld [vmem:[#allocation3 + $0x40] sm:$0xff] }
 0xdf1   :  { %2747 = vmatmul.msk.f32.gmra.mxu2 %vm279_vm2, %v1018_v55 }
 0xdf9   :  { %2748 = vmatmul.msk.f32.gmra.mxu2 %vm279_vm2, %v1019_v56 }
 0xe01   :  { %2749 = vmatmul.msk.f32.gmra.mxu2 %vm279_vm2, %v1020_v57 }
 0xe09   :  { %2750 = vmatmul.msk.f32.gmra.mxu2 %vm279_vm2, %v1021_v60 }
 0xe11   :  { %2751 = vmatmul.msk.f32.gmra.mxu2 %vm279_vm2, %v1022_v0  ;;  %v1410_v0 = vld [vmem:[#allocation3 + $0x78] sm:$0xff] }
 0xe19   :  { %2752 = vmatmul.msk.f32.gmra.mxu2 %vm279_vm2, %v1023_v4  ;;  %v1408_v4 = vld [vmem:[#allocation3 + $0x68] sm:$0xff] }
 0xe1c   :  { %v950_v8 = vpop.f32.mrf.mxu2 }
 0xe1d   :  { %v953_v10 = vadd.f32 %v950_v8, %v271_v6  ;;  %v1407_v6 = vld [vmem:[#allocation3 + $0x60] sm:$0xff] }
 0xe1f   :  { %2878 = vtanh.f32 %v953_v10 }
 0xe21   :  { %2753 = vmatmul.msk.f32.gmra.mxu2 %vm279_vm2, %v1024_v12 }
 0xe24   :  { %v1149_v21 = vpop.f32.mrf.mxu2 }
 0xe25   :  { %v2879_v13 = vpop.eup %2878  ;;  %v1150_v7 = vadd.f32 %v3466_v5, %v1149_v21 }
 0xe26   :  { %955 = vst.msk [vmem:[#allocation2 + $0xc8] sm:$0xff] %vm279_vm2, %v2879_v13  ;;  %2735 = vmatmul.msk.f32.vlgmr.msrb.gmra.mxu3 %vm279_vm2, %v2879_v13 }
 0xe27   :  { %1305 = vmatpush.msrb.mxu3 %v1289_v37  ;;  %v1614_v37 = vld [vmem:[#allocation3 + $0xf8] sm:$0xff] }
 0xe29   :  { %2754 = vmatmul.msk.f32.gmra.mxu2 %vm279_vm2, %v1025_v14  ;;  %1306 = vmatpush.msrb.mxu3 %v1288_v38  ;;  %v1461_v14 = vld [vmem:[#allocation3 + $0x98] sm:$0xff]  ;;  %v1613_v38 = vld [vmem:[#allocation3 + $0xf0] sm:$0xff] }
 0xe2b   :  { %1307 = vmatpush.msrb.mxu3 %v1287_v39  ;;  %v1612_v39 = vld [vmem:[#allocation3 + $0xe8] sm:$0xff] }
 0xe2c   :  { %v1152_v23 = vpop.f32.mrf.mxu2 }
 0xe2d   :  { %v1033_v22 = vld [vmem:[#allocation2 + $0xc8] sm:$0xff]  ;;  %1308 = vmatpush.msrb.mxu3 %v1286_v40  ;;  %v1153_v45 = vadd.f32 %v3466_v5, %v1152_v23  ;;  %v1511_v23 = vld [vmem:[#allocation3 + $0xb0] sm:$0xff]  ;;  %v1611_v40 = vld [vmem:[#allocation3 + $0xe0] sm:$0xff] }
 0xe2e   :  { %1250 = vmatmul.f32.vlgmr.msra.gmra.mxu3 %v3000_v9  ;;  %v1032_v9 = vld [vmem:[#allocation2 + $0xc0] sm:$0xff] }
 0xe2f   :  { %1345 = vmatpush.msra.mxu3 %v3412_v58 }
 0xe31   :  { %2755 = vmatmul.msk.f32.gmra.mxu2 %vm279_vm2, %v1026_v15  ;;  %1346 = vmatpush.msra.mxu3 %v3417_v59  ;;  %v1460_v15 = vld [vmem:[#allocation3 + $0x90] sm:$0xff] }
 0xe33   :  { %1347 = vmatpush.msra.mxu3 %v3429_v62 }
 0xe34   :  { %v1155_v36 = vpop.f32.mrf.mxu2 }
 0xe35   :  { %1348 = vmatpush.msra.mxu3 %v3437_v63  ;;  %v1156_v56 = vadd.f32 %v3466_v5, %v1155_v36 }
 0xe39   :  { %2756 = vmatmul.msk.f32.gmra.mxu2 %vm279_vm2, %v1027_v16  ;;  %v1459_v16 = vld [vmem:[#allocation3 + $0x88] sm:$0xff] }
 0xe3c   :  { %v1158_v51 = vpop.f32.mrf.mxu2 }
 0xe3d   :  { %v1159_v8 = vadd.f32 %v3466_v5, %v1158_v51 }
 0xe41   :  { %2757 = vmatmul.msk.f32.gmra.mxu2 %vm279_vm2, %v1028_v17  ;;  %v1458_v17 = vld [vmem:[#allocation3 + $0x80] sm:$0xff] }
 0xe49   :  { %2758 = vmatmul.msk.f32.gmra.mxu2 %vm279_vm2, %v1029_v18  ;;  %v1161_v18 = vpop.f32.mrf.mxu2 }
 0xe51   :  { %2759 = vmatmul.msk.f32.gmra.mxu2 %vm279_vm2, %v1030_v19  ;;  %v1162_v19 = vadd.f32 %v3466_v5, %v1161_v18 }
 0xe59   :  { %2760 = vmatmul.msk.f32.gmra.mxu2 %vm279_vm2, %v1031_v20 }
 0xe61   :  { %2761 = vmatmul.msk.f32.gmra.mxu2 %vm279_vm2, %v1032_v9 }
 0xe69   :  { %2762 = vmatmul.msk.f32.gmra.mxu2 %vm279_vm2, %v1033_v22  ;;  %v1512_v22 = vld [vmem:[#allocation3 + $0xb8] sm:$0xff] }
 0xea9   :  { %v976_v2 = vpop.f32.mrf.mxu3 }
 0xeaa   :  { %v979_v3 = vadd.f32 %v976_v2, %v274_v26  ;;  %v1164_v26 = vpop.f32.mrf.mxu2 }
 0xeab   :  { %v1165_v2 = vadd.f32 %v3466_v5, %v1164_v26 }
 0xeac   :  { %2880 = vtanh.f32 %v979_v3 }
 0xeb1   :  { %v1251_v27 = vpop.f32.mrf.mxu3 }
 0xeb2   :  { %v2881_v29 = vpop.eup %2880  ;;  %v1254_v30 = vadd.f32 %v1251_v27, %v1150_v7 }
 0xeb3   :  { %981 = vst.msk [vmem:[#allocation2 + $0xd0] sm:$0xff] %vm279_vm2, %v2881_v29  ;;  %2736 = vmatmul.msk.f32.vlgmr.msra.gmra.mxu1 %vm279_vm2, %v2881_v29  ;;  %v1562_v29 = vld [vmem:[#allocation3 + $0xd0] sm:$0xff] }
 0xeb4   :  { %2882 = vtanh.f32 %v1254_v30  ;;  %1325 = vmatpush.msra.mxu1 %v1259_v28  ;;  %v1563_v28 = vld [vmem:[#allocation3 + $0xd8] sm:$0xff]  ;;  %v1561_v30 = vld [vmem:[#allocation3 + $0xc8] sm:$0xff] }
 0xeb6   :  { %1326 = vmatpush.msra.mxu1 %v1258_v31  ;;  %v1560_v31 = vld [vmem:[#allocation3 + $0xc0] sm:$0xff] }
 0xeb8   :  { %1327 = vmatpush.msra.mxu1 %v1257_v32  ;;  %v1167_v32 = vpop.f32.mrf.mxu2 }
 0xeba   :  { %v2883_v34 = vpop.eup %2882  ;;  %v1034_v35 = vld [vmem:[#allocation2 + $0xd0] sm:$0xff]  ;;  %1328 = vmatpush.msra.mxu1 %v1256_v33  ;;  %v1168_v33 = vadd.f32 %v3466_v5, %v1167_v32 }
 0xebb   :  { %2763 = vmatmul.msk.f32.gmra.mxu2 %vm279_vm2, %v1034_v35  ;;  %2765 = vmatmul.msk.f32.vlgmr.msrb.gmra.mxu1 %vm279_vm2, %v2883_v34 }
 0xebc   :  { %1375 = vmatpush.msrb.mxu1 %v1359_v11 }
 0xebe   :  { %1376 = vmatpush.msrb.mxu1 %v1358_v52 }
 0xec0   :  { %1377 = vmatpush.msrb.mxu1 %v1357_v53  ;;  %v1170_v41 = vpop.f32.mrf.mxu2 }
 0xec2   :  { %1378 = vmatpush.msrb.mxu1 %v1356_v54  ;;  %v1716_v54 = vld [vmem:[#allocation3 + $0x138] sm:$0xff] }
 0xec3   :  { %2767 = vmatmul.msk.f32.vlgmr.msra.gmra.mxu1 %vm279_vm2, %v2883_v34 }
 0xec4   :  { %1426 = vmatpush.msra.mxu1 %v1410_v0 }
 0xec6   :  { %1427 = vmatpush.msra.mxu1 %v1409_v1 }
 0xec8   :  { %1428 = vmatpush.msra.mxu1 %v1408_v4 }
 0xeca   :  { %1429 = vmatpush.msra.mxu1 %v1407_v6 }
 0xf30   :  { %v1002_v43 = vpop.f32.mrf.mxu1 }
 0xf31   :  { %v1005_v44 = vadd.f32 %v1002_v43, %v277_v42  ;;  %v1171_v42 = vadd.f32 %v3466_v5, %v1170_v41 }
 0xf33   :  { %2884 = vtanh.f32 %v1005_v44 }
 0xf38   :  { %v1280_v46 = vpop.f32.mrf.mxu1 }
 0xf39   :  { %v2885_v47 = vpop.eup %2884  ;;  %v1283_v48 = vadd.f32 %v1280_v46, %v1153_v45  ;;  %v1665_v46 = vld [vmem:[#allocation3 + $0x118] sm:$0xff] }
 0xf3a   :  { %1007 = vst.msk [vmem:[#allocation2 + $0xd8] sm:$0xff] %vm279_vm2, %v2885_v47  ;;  %v1664_v47 = vld [vmem:[#allocation3 + $0x110] sm:$0xff] }
 0xf3b   :  { %2886 = vtanh.f32 %v1283_v48  ;;  %v1663_v48 = vld [vmem:[#allocation3 + $0x108] sm:$0xff] }
 0xf41   :  { %v2887_v49 = vpop.eup %2886  ;;  %v1035_v50 = vld [vmem:[#allocation2 + $0xd8] sm:$0xff] }
 0xf42   :  { %2764 = vmatmul.msk.f32.gmra.mxu2 %vm279_vm2, %v1035_v50  ;;  %2766 = vmatmul.msk.f32.vlgmr.msrb.gmra.mxu3 %vm279_vm2, %v2887_v49  ;;  %v1173_v50 = vpop.f32.mrf.mxu2 }
 0xf43   :  { %1396 = vmatpush.msrb.mxu3 %v3412_v58  ;;  %v1174_v51 = vadd.f32 %v3466_v5, %v1173_v50 }
 0xf45   :  { %1397 = vmatpush.msrb.mxu3 %v3417_v59 }
 0xf47   :  { %1398 = vmatpush.msrb.mxu3 %v3429_v62 }
 0xf49   :  { %1399 = vmatpush.msrb.mxu3 %v3437_v63 }
 0xf4a   :  { %2768 = vmatmul.msk.f32.vlgmr.msra.gmra.mxu3 %vm279_vm2, %v2887_v49  ;;  %v1662_v49 = vld [vmem:[#allocation3 + $0x100] sm:$0xff] }
 0xf4b   :  { %1447 = vmatpush.msra.mxu3 %v3412_v58 }
 0xf4d   :  { %1448 = vmatpush.msra.mxu3 %v3417_v59 }
 0xf4f   :  { %1449 = vmatpush.msra.mxu3 %v3429_v62 }
 0xf51   :  { %1450 = vmatpush.msra.mxu3 %v3437_v63 }
 0xfc5   :  { %v3492_v55 = vpop.f32.mrf.mxu3 }
 0xfcd   :  { %v1350_v57 = vpop.f32.mrf.mxu3 }
 0xfce   :  { %v1353_v60 = vadd.f32 %v1350_v57, %v1156_v56  ;;  %v1715_v56 = vld [vmem:[#allocation3 + $0x130] sm:$0xff]  ;;  %v1714_v57 = vld [vmem:[#allocation3 + $0x128] sm:$0xff] }
 0xfd0   :  { %2888 = vtanh.f32 %v1353_v60  ;;  %v1713_v60 = vld [vmem:[#allocation3 + $0x120] sm:$0xff] }
 0xfd6   :  { %v2889_v61 = vpop.eup %2888 }
 0xfd7   :  { %2769 = vmatmul.msk.f32.vlgmr.msrb.gmra.mxu1 %vm279_vm2, %v2889_v61  ;;  %2770 = vmatmul.msk.f32.vlgmr.msrb.gmra.mxu3 %vm279_vm2, %v2889_v61  ;;  %v1176_v61 = vpop.f32.mrf.mxu2 }
 0xfd8   :  { %1498 = vmatpush.msrb.mxu3 %v3412_v58  ;;  %1477 = vmatpush.msrb.mxu1 %v1461_v14  ;;  %v1177_v0 = vadd.f32 %v3466_v5, %v1176_v61 }
 0xfda   :  { %1499 = vmatpush.msrb.mxu3 %v3417_v59  ;;  %1478 = vmatpush.msrb.mxu1 %v1460_v15 }
 0xfdc   :  { %1500 = vmatpush.msrb.mxu3 %v3429_v62  ;;  %1479 = vmatpush.msrb.mxu1 %v1459_v16 }
 0xfde   :  { %1501 = vmatpush.msrb.mxu3 %v3437_v63  ;;  %1480 = vmatpush.msrb.mxu1 %v1458_v17 }
 0xfdf   :  { %v1179_v14 = vpop.f32.mrf.mxu2 }
 0xfe0   :  { %v1180_v15 = vadd.f32 %v3466_v5, %v1179_v14 }
0x105a   :  { %v1401_v10 = vpop.f32.mrf.mxu3 }
0x105b   :  { %v1404_v12 = vadd.f32 %v1401_v10, %v1159_v8  ;;  %v1767_v8 = vld [vmem:[#allocation3 + $0x158] sm:$0xff]  ;;  %v1766_v10 = vld [vmem:[#allocation3 + $0x150] sm:$0xff] }
0x105d   :  { %2890 = vtanh.f32 %v1404_v12  ;;  %v1765_v12 = vld [vmem:[#allocation3 + $0x148] sm:$0xff] }
0x1063   :  { %v2891_v13 = vpop.eup %2890 }
0x1064   :  { %2771 = vmatmul.msk.f32.vlgmr.msra.gmra.mxu1 %vm279_vm2, %v2891_v13  ;;  %2772 = vmatmul.msk.f32.vlgmr.msra.gmra.mxu3 %vm279_vm2, %v2891_v13  ;;  %v1764_v13 = vld [vmem:[#allocation3 + $0x140] sm:$0xff] }
0x1065   :  { %1549 = vmatpush.msra.mxu3 %v3412_v58  ;;  %1528 = vmatpush.msra.mxu1 %v1512_v22  ;;  %v1182_v22 = vpop.f32.mrf.mxu2 }
0x1067   :  { %1550 = vmatpush.msra.mxu3 %v3417_v59  ;;  %1529 = vmatpush.msra.mxu1 %v1511_v23  ;;  %v1183_v23 = vadd.f32 %v3466_v5, %v1182_v22 }
0x1069   :  { %1551 = vmatpush.msra.mxu3 %v3429_v62  ;;  %1530 = vmatpush.msra.mxu1 %v1510_v24 }
0x106b   :  { %1552 = vmatpush.msra.mxu3 %v3437_v63  ;;  %1531 = vmatpush.msra.mxu1 %v1509_v25 }
0x10e7   :  { %v1452_v20 = vpop.f32.mrf.mxu3 }
0x10e8   :  { %v1455_v21 = vadd.f32 %v1452_v20, %v1162_v19  ;;  %v1818_v19 = vld [vmem:[#allocation3 + $0x178] sm:$0xff]  ;;  %v1817_v20 = vld [vmem:[#allocation3 + $0x170] sm:$0xff] }
0x10ea   :  { %2892 = vtanh.f32 %v1455_v21  ;;  %v1816_v21 = vld [vmem:[#allocation3 + $0x168] sm:$0xff] }
0x10f0   :  { %v2893_v9 = vpop.eup %2892 }
0x10f1   :  { %2773 = vmatmul.msk.f32.vlgmr.msrb.gmra.mxu1 %vm279_vm2, %v2893_v9  ;;  %2774 = vmatmul.msk.f32.vlgmr.msrb.gmra.mxu3 %vm279_vm2, %v2893_v9  ;;  %v1815_v9 = vld [vmem:[#allocation3 + $0x160] sm:$0xff] }
0x10f2   :  { %1600 = vmatpush.msrb.mxu3 %v3412_v58  ;;  %1579 = vmatpush.msrb.mxu1 %v1563_v28  ;;  %v1185_v28 = vpop.f32.mrf.mxu2 }
0x10f4   :  { %1601 = vmatpush.msrb.mxu3 %v3417_v59  ;;  %1580 = vmatpush.msrb.mxu1 %v1562_v29  ;;  %v1186_v29 = vadd.f32 %v3466_v5, %v1185_v28 }
0x10f6   :  { %1602 = vmatpush.msrb.mxu3 %v3429_v62  ;;  %1581 = vmatpush.msrb.mxu1 %v1561_v30 }
0x10f8   :  { %1603 = vmatpush.msrb.mxu3 %v3437_v63  ;;  %1582 = vmatpush.msrb.mxu1 %v1560_v31 }
0x1174   :  { %v1503_v3 = vpop.f32.mrf.mxu3 }
0x1175   :  { %v1506_v7 = vadd.f32 %v1503_v3, %v1165_v2  ;;  %v1869_v2 = vld [vmem:[#allocation3 + $0x198] sm:$0xff]  ;;  %v1868_v3 = vld [vmem:[#allocation3 + $0x190] sm:$0xff] }
0x1177   :  { %2894 = vtanh.f32 %v1506_v7  ;;  %v1867_v7 = vld [vmem:[#allocation3 + $0x188] sm:$0xff] }
0x117d   :  { %v2895_v27 = vpop.eup %2894 }
0x117e   :  { %2775 = vmatmul.msk.f32.vlgmr.msra.gmra.mxu1 %vm279_vm2, %v2895_v27  ;;  %2776 = vmatmul.msk.f32.vlgmr.msra.gmra.mxu3 %vm279_vm2, %v2895_v27  ;;  %v1866_v27 = vld [vmem:[#allocation3 + $0x180] sm:$0xff] }
0x117f   :  { %1651 = vmatpush.msra.mxu3 %v3412_v58  ;;  %1630 = vmatpush.msra.mxu1 %v1614_v37  ;;  %v1188_v37 = vpop.f32.mrf.mxu2 }
0x1181   :  { %1652 = vmatpush.msra.mxu3 %v3417_v59  ;;  %1631 = vmatpush.msra.mxu1 %v1613_v38  ;;  %v1189_v38 = vadd.f32 %v3466_v5, %v1188_v37 }
0x1183   :  { %1653 = vmatpush.msra.mxu3 %v3429_v62  ;;  %1632 = vmatpush.msra.mxu1 %v1612_v39 }
0x1185   :  { %1654 = vmatpush.msra.mxu3 %v3437_v63  ;;  %1633 = vmatpush.msra.mxu1 %v1611_v40 }
0x1201   :  { %v1554_v34 = vpop.f32.mrf.mxu3 }
0x1202   :  { %v1557_v35 = vadd.f32 %v1554_v34, %v1168_v33  ;;  %v1920_v33 = vld [vmem:[#allocation3 + $0x1b8] sm:$0xff]  ;;  %v1919_v34 = vld [vmem:[#allocation3 + $0x1b0] sm:$0xff] }
0x1204   :  { %2896 = vtanh.f32 %v1557_v35  ;;  %v1918_v35 = vld [vmem:[#allocation3 + $0x1a8] sm:$0xff] }
0x120a   :  { %v2897_v36 = vpop.eup %2896 }
0x120b   :  { %2777 = vmatmul.msk.f32.vlgmr.msrb.gmra.mxu1 %vm279_vm2, %v2897_v36  ;;  %2778 = vmatmul.msk.f32.vlgmr.msrb.gmra.mxu3 %vm279_vm2, %v2897_v36  ;;  %v1917_v36 = vld [vmem:[#allocation3 + $0x1a0] sm:$0xff] }
0x120c   :  { %1702 = vmatpush.msrb.mxu3 %v3412_v58  ;;  %1681 = vmatpush.msrb.mxu1 %v1665_v46  ;;  %v1191_v46 = vpop.f32.mrf.mxu2 }
0x120e   :  { %1703 = vmatpush.msrb.mxu3 %v3417_v59  ;;  %1682 = vmatpush.msrb.mxu1 %v1664_v47  ;;  %v1192_v47 = vadd.f32 %v3466_v5, %v1191_v46  ;;  %v2223_v46 = vld [vmem:[#allocation3 + $0x260] sm:$0xff] }
0x1210   :  { %1704 = vmatpush.msrb.mxu3 %v3429_v62  ;;  %1683 = vmatpush.msrb.mxu1 %v1663_v48 }
0x1212   :  { %1705 = vmatpush.msrb.mxu3 %v3437_v63  ;;  %1684 = vmatpush.msrb.mxu1 %v1662_v49 }
0x128e   :  { %v1605_v43 = vpop.f32.mrf.mxu3 }
0x128f   :  { %v1608_v44 = vadd.f32 %v1605_v43, %v1171_v42  ;;  %v1971_v42 = vld [vmem:[#allocation3 + $0x1d8] sm:$0xff]  ;;  %v1970_v43 = vld [vmem:[#allocation3 + $0x1d0] sm:$0xff] }
0x1291   :  { %2898 = vtanh.f32 %v1608_v44  ;;  %v1969_v44 = vld [vmem:[#allocation3 + $0x1c8] sm:$0xff] }
0x1297   :  { %v2899_v45 = vpop.eup %2898 }
0x1298   :  { %2779 = vmatmul.msk.f32.vlgmr.msra.gmra.mxu1 %vm279_vm2, %v2899_v45  ;;  %2780 = vmatmul.msk.f32.vlgmr.msra.gmra.mxu3 %vm279_vm2, %v2899_v45  ;;  %v1968_v45 = vld [vmem:[#allocation3 + $0x1c0] sm:$0xff] }
0x1299   :  { %1753 = vmatpush.msra.mxu3 %v3412_v58  ;;  %1732 = vmatpush.msra.mxu1 %v1716_v54  ;;  %v1194_v54 = vpop.f32.mrf.mxu2 }
0x129b   :  { %1754 = vmatpush.msra.mxu3 %v3417_v59  ;;  %1733 = vmatpush.msra.mxu1 %v1715_v56  ;;  %v1195_v56 = vadd.f32 %v3466_v5, %v1194_v54  ;;  %v2277_v54 = vld [vmem:[#allocation3 + $0x298] sm:$0xff] }
0x129d   :  { %1755 = vmatpush.msra.mxu3 %v3429_v62  ;;  %1734 = vmatpush.msra.mxu1 %v1714_v57 }
0x129f   :  { %1756 = vmatpush.msra.mxu3 %v3437_v63  ;;  %1735 = vmatpush.msra.mxu1 %v1713_v60 }
0x131b   :  { %v1656_v11 = vpop.f32.mrf.mxu3 }
0x131c   :  { %v1659_v52 = vadd.f32 %v1656_v11, %v1174_v51  ;;  %v2022_v51 = vld [vmem:[#allocation3 + $0x1f8] sm:$0xff]  ;;  %v2021_v11 = vld [vmem:[#allocation3 + $0x1f0] sm:$0xff] }
0x131e   :  { %2900 = vtanh.f32 %v1659_v52  ;;  %v2020_v52 = vld [vmem:[#allocation3 + $0x1e8] sm:$0xff] }
0x1324   :  { %v2901_v53 = vpop.eup %2900 }
0x1325   :  { %2781 = vmatmul.msk.f32.vlgmr.msrb.gmra.mxu1 %vm279_vm2, %v2901_v53  ;;  %2782 = vmatmul.msk.f32.vlgmr.msrb.gmra.mxu3 %vm279_vm2, %v2901_v53  ;;  %v2019_v53 = vld [vmem:[#allocation3 + $0x1e0] sm:$0xff] }
0x1326   :  { %1804 = vmatpush.msrb.mxu3 %v3412_v58  ;;  %1783 = vmatpush.msrb.mxu1 %v1767_v8  ;;  %v1197_v8 = vpop.f32.mrf.mxu2 }
0x1328   :  { %1805 = vmatpush.msrb.mxu3 %v3417_v59  ;;  %1784 = vmatpush.msrb.mxu1 %v1766_v10  ;;  %v1198_v10 = vadd.f32 %v3466_v5, %v1197_v8 }
0x132a   :  { %1806 = vmatpush.msrb.mxu3 %v3429_v62  ;;  %1785 = vmatpush.msrb.mxu1 %v1765_v12 }
0x132c   :  { %1807 = vmatpush.msrb.mxu3 %v3437_v63  ;;  %1786 = vmatpush.msrb.mxu1 %v1764_v13 }
0x13a8   :  { %v1707_v1 = vpop.f32.mrf.mxu3 }
0x13a9   :  { %v1710_v4 = vadd.f32 %v1707_v1, %v1177_v0  ;;  %v2073_v0 = vld [vmem:[#allocation3 + $0x218] sm:$0xff]  ;;  %v2072_v1 = vld [vmem:[#allocation3 + $0x210] sm:$0xff] }
0x13ab   :  { %2902 = vtanh.f32 %v1710_v4  ;;  %v2071_v4 = vld [vmem:[#allocation3 + $0x208] sm:$0xff] }
0x13b1   :  { %v2903_v6 = vpop.eup %2902 }
0x13b2   :  { %2783 = vmatmul.msk.f32.vlgmr.msra.gmra.mxu1 %vm279_vm2, %v2903_v6  ;;  %2784 = vmatmul.msk.f32.vlgmr.msra.gmra.mxu3 %vm279_vm2, %v2903_v6  ;;  %v2070_v6 = vld [vmem:[#allocation3 + $0x200] sm:$0xff] }
0x13b3   :  { %1855 = vmatpush.msra.mxu3 %v3412_v58  ;;  %1834 = vmatpush.msra.mxu1 %v1818_v19  ;;  %v2175_v19 = vld [vmem:[#allocation3 + $0x258] sm:$0xff] }
0x13b4   :  { %2191 = vmatpush.msrb.mxu0 %v2175_v19 }
0x13b5   :  { %1856 = vmatpush.msra.mxu3 %v3417_v59  ;;  %1835 = vmatpush.msra.mxu1 %v1817_v20  ;;  %v2174_v20 = vld [vmem:[#allocation3 + $0x250] sm:$0xff] }
0x13b6   :  { %2192 = vmatpush.msrb.mxu0 %v2174_v20 }
0x13b7   :  { %1857 = vmatpush.msra.mxu3 %v3429_v62  ;;  %1836 = vmatpush.msra.mxu1 %v1816_v21  ;;  %v1200_v21 = vpop.f32.mrf.mxu2 }
0x13b9   :  { %1858 = vmatpush.msra.mxu3 %v3437_v63  ;;  %1837 = vmatpush.msra.mxu1 %v1815_v9  ;;  %v1201_v9 = vadd.f32 %v3466_v5, %v1200_v21  ;;  %v2379_v21 = vld [vmem:[#allocation3 + $0x2d8] sm:$0xff] }
0x1435   :  { %v1758_v16 = vpop.f32.mrf.mxu3 }
0x1436   :  { %v1761_v17 = vadd.f32 %v1758_v16, %v1180_v15  ;;  %v2124_v15 = vld [vmem:[#allocation3 + $0x238] sm:$0xff]  ;;  %v2123_v16 = vld [vmem:[#allocation3 + $0x230] sm:$0xff] }
0x1438   :  { %2904 = vtanh.f32 %v1761_v17  ;;  %v2122_v17 = vld [vmem:[#allocation3 + $0x228] sm:$0xff] }
0x143e   :  { %v2905_v18 = vpop.eup %2904 }
0x143f   :  { %2785 = vmatmul.msk.f32.vlgmr.msrb.gmra.mxu1 %vm279_vm2, %v2905_v18  ;;  %2786 = vmatmul.msk.f32.vlgmr.msrb.gmra.mxu3 %vm279_vm2, %v2905_v18  ;;  %v2121_v18 = vld [vmem:[#allocation3 + $0x220] sm:$0xff] }
0x1440   :  { %1906 = vmatpush.msrb.mxu3 %v3412_v58  ;;  %1885 = vmatpush.msrb.mxu1 %v1869_v2  ;;  %v1203_v2 = vpop.f32.mrf.mxu2 }
0x1442   :  { %1907 = vmatpush.msrb.mxu3 %v3417_v59  ;;  %1886 = vmatpush.msrb.mxu1 %v1868_v3  ;;  %v1204_v3 = vadd.f32 %v3466_v5, %v1203_v2 }
0x1444   :  { %1908 = vmatpush.msrb.mxu3 %v3429_v62  ;;  %1887 = vmatpush.msrb.mxu1 %v1867_v7  ;;  %v3607_v7 = vpop.f32.mrf.mxu1 }
0x1446   :  { %1909 = vmatpush.msrb.mxu3 %v3437_v63  ;;  %1888 = vmatpush.msrb.mxu1 %v1866_v27 }
0x14c2   :  { %v1809_v24 = vpop.f32.mrf.mxu3 }
0x14c3   :  { %v1812_v25 = vadd.f32 %v1809_v24, %v1183_v23 }
0x14c5   :  { %2906 = vtanh.f32 %v1812_v25  ;;  %v2173_v25 = vld [vmem:[#allocation3 + $0x248] sm:$0xff] }
0x14c6   :  { %2193 = vmatpush.msrb.mxu0 %v2173_v25 }
0x14cb   :  { %v2907_v26 = vpop.eup %2906 }
0x14cc   :  { %2787 = vmatmul.msk.f32.vlgmr.msra.gmra.mxu1 %vm279_vm2, %v2907_v26  ;;  %2788 = vmatmul.msk.f32.vlgmr.msra.gmra.mxu3 %vm279_vm2, %v2907_v26  ;;  %v2172_v26 = vld [vmem:[#allocation3 + $0x240] sm:$0xff] }
0x14cd   :  { %1957 = vmatpush.msra.mxu3 %v3412_v58  ;;  %1936 = vmatpush.msra.mxu1 %v1920_v33 }
0x14ce   :  { %2194 = vmatpush.msrb.mxu0 %v2172_v26 }
0x14cf   :  { %1958 = vmatpush.msra.mxu3 %v3417_v59  ;;  %1937 = vmatpush.msra.mxu1 %v1919_v34 }
0x14d0   :  { %2263 = vmatpush.msra.mxu0 %v3412_v58 }
0x14d1   :  { %1959 = vmatpush.msra.mxu3 %v3429_v62  ;;  %1938 = vmatpush.msra.mxu1 %v1918_v35 }
0x14d2   :  { %2264 = vmatpush.msra.mxu0 %v3417_v59 }
0x14d3   :  { %1960 = vmatpush.msra.mxu3 %v3437_v63  ;;  %1939 = vmatpush.msra.mxu1 %v1917_v36 }
0x14d4   :  { %2265 = vmatpush.msra.mxu0 %v3429_v62 }
0x14d6   :  { %2266 = vmatpush.msra.mxu0 %v3437_v63 }
0x154f   :  { %v1860_v30 = vpop.f32.mrf.mxu3 }
0x1550   :  { %v1863_v31 = vadd.f32 %v1860_v30, %v1186_v29  ;;  %v3609_v29 = vpop.f32.mrf.mxu1 }
0x1552   :  { %2908 = vtanh.f32 %v1863_v31 }
0x1558   :  { %v2909_v32 = vpop.eup %2908  ;;  %v3613_v31 = vpop.f32.mrf.mxu1 }
0x1559   :  { %2789 = vmatmul.msk.f32.vlgmr.msrb.gmra.mxu1 %vm279_vm2, %v2909_v32  ;;  %2790 = vmatmul.msk.f32.vlgmr.msrb.gmra.mxu3 %vm279_vm2, %v2909_v32 }
0x155a   :  { %2008 = vmatpush.msrb.mxu3 %v3412_v58  ;;  %1987 = vmatpush.msrb.mxu1 %v1971_v42 }
0x155c   :  { %2009 = vmatpush.msrb.mxu3 %v3417_v59  ;;  %1988 = vmatpush.msrb.mxu1 %v1970_v43  ;;  %v2226_v43 = vld [vmem:[#allocation3 + $0x278] sm:$0xff] }
0x155e   :  { %2010 = vmatpush.msrb.mxu3 %v3429_v62  ;;  %1989 = vmatpush.msrb.mxu1 %v1969_v44  ;;  %v2225_v44 = vld [vmem:[#allocation3 + $0x270] sm:$0xff] }
0x1560   :  { %2011 = vmatpush.msrb.mxu3 %v3437_v63  ;;  %1990 = vmatpush.msrb.mxu1 %v1968_v45  ;;  %v3615_v32 = vpop.f32.mrf.mxu1  ;;  %v2224_v45 = vld [vmem:[#allocation3 + $0x268] sm:$0xff] }
0x1568   :  { %v3617_v33 = vpop.f32.mrf.mxu1 }
0x1570   :  { %v3619_v34 = vpop.f32.mrf.mxu1 }
0x1578   :  { %v3621_v35 = vpop.f32.mrf.mxu1 }
0x1580   :  { %v3623_v36 = vpop.f32.mrf.mxu1 }
0x1588   :  { %v3625_v37 = vpop.f32.mrf.mxu1 }
0x15dc   :  { %v1911_v39 = vpop.f32.mrf.mxu3 }
0x15dd   :  { %v1914_v40 = vadd.f32 %v1911_v39, %v1189_v38  ;;  %v3627_v38 = vpop.f32.mrf.mxu1 }
0x15df   :  { %2910 = vtanh.f32 %v1914_v40 }
0x15e5   :  { %v2911_v41 = vpop.eup %2910  ;;  %v3629_v39 = vpop.f32.mrf.mxu1 }
0x15e6   :  { %2791 = vmatmul.msk.f32.vlgmr.msra.gmra.mxu1 %vm279_vm2, %v2911_v41  ;;  %2792 = vmatmul.msk.f32.vlgmr.msra.gmra.mxu3 %vm279_vm2, %v2911_v41 }
0x15e7   :  { %2059 = vmatpush.msra.mxu3 %v3412_v58  ;;  %2038 = vmatpush.msra.mxu1 %v2022_v51 }
0x15e9   :  { %2060 = vmatpush.msra.mxu3 %v3417_v59  ;;  %2039 = vmatpush.msra.mxu1 %v2021_v11 }
0x15eb   :  { %2061 = vmatpush.msra.mxu3 %v3429_v62  ;;  %2040 = vmatpush.msra.mxu1 %v2020_v52 }
0x15ed   :  { %2062 = vmatpush.msra.mxu3 %v3437_v63  ;;  %2041 = vmatpush.msra.mxu1 %v2019_v53  ;;  %v3631_v40 = vpop.f32.mrf.mxu1 }
0x1663   :  { %v3633_v41 = vpop.f32.mrf.mxu1 }
0x1669   :  { %v1962_v48 = vpop.f32.mrf.mxu3 }
0x166a   :  { %v1965_v49 = vadd.f32 %v1962_v48, %v1192_v47 }
0x166c   :  { %2912 = vtanh.f32 %v1965_v49 }
0x1672   :  { %v2913_v50 = vpop.eup %2912 }
0x1673   :  { %2793 = vmatmul.msk.f32.vlgmr.msrb.gmra.mxu1 %vm279_vm2, %v2913_v50  ;;  %2794 = vmatmul.msk.f32.vlgmr.msrb.gmra.mxu3 %vm279_vm2, %v2913_v50  ;;  %v1206_v50 = vpop.f32.mrf.mxu2 }
0x1674   :  { %2110 = vmatpush.msrb.mxu3 %v3412_v58  ;;  %2089 = vmatpush.msrb.mxu1 %v2073_v0  ;;  %v1207_v51 = vadd.f32 %v3466_v5, %v1206_v50 }
0x1676   :  { %2111 = vmatpush.msrb.mxu3 %v3417_v59  ;;  %2090 = vmatpush.msrb.mxu1 %v2072_v1 }
0x1678   :  { %2112 = vmatpush.msrb.mxu3 %v3429_v62  ;;  %2091 = vmatpush.msrb.mxu1 %v2071_v4 }
0x167a   :  { %2113 = vmatpush.msrb.mxu3 %v3437_v63  ;;  %2092 = vmatpush.msrb.mxu1 %v2070_v6 }
0x167b   :  { %v1209_v0 = vpop.f32.mrf.mxu2 }
0x167c   :  { %v1210_v1 = vadd.f32 %v3466_v5, %v1209_v0  ;;  %v2944_v0 = vld [vmem:[%s3764_s6] ss:$0 sm:$0xff] }
0x16f0   :  { %v3635_v42 = vpop.f32.mrf.mxu1 }
0x16f6   :  { %v2013_v57 = vpop.f32.mrf.mxu3 }
0x16f7   :  { %v2016_v60 = vadd.f32 %v2013_v57, %v1195_v56  ;;  %v2276_v56 = vld [vmem:[#allocation3 + $0x290] sm:$0xff]  ;;  %v2275_v57 = vld [vmem:[#allocation3 + $0x288] sm:$0xff] }
0x16f9   :  { %2914 = vtanh.f32 %v2016_v60  ;;  %v2274_v60 = vld [vmem:[#allocation3 + $0x280] sm:$0xff] }
0x16ff   :  { %v2915_v61 = vpop.eup %2914 }
0x1700   :  { %2795 = vmatmul.msk.f32.vlgmr.msra.gmra.mxu1 %vm279_vm2, %v2915_v61  ;;  %2796 = vmatmul.msk.f32.vlgmr.msra.gmra.mxu3 %vm279_vm2, %v2915_v61 }
0x1701   :  { %2161 = vmatpush.msra.mxu3 %v3412_v58  ;;  %2140 = vmatpush.msra.mxu1 %v2124_v15 }
0x1703   :  { %2162 = vmatpush.msra.mxu3 %v3417_v59  ;;  %2141 = vmatpush.msra.mxu1 %v2123_v16  ;;  %v1212_v16 = vpop.f32.mrf.mxu2 }
0x1705   :  { %2163 = vmatpush.msra.mxu3 %v3429_v62  ;;  %2142 = vmatpush.msra.mxu1 %v2122_v17  ;;  %v1213_v17 = vadd.f32 %v3466_v5, %v1212_v16 }
0x1707   :  { %2164 = vmatpush.msra.mxu3 %v3437_v63  ;;  %2143 = vmatpush.msra.mxu1 %v2121_v18 }
0x170b   :  { %v1215_v25 = vpop.f32.mrf.mxu2 }
0x170c   :  { %v1216_v26 = vadd.f32 %v3466_v5, %v1215_v25 }
0x177d   :  { %v3637_v47 = vpop.f32.mrf.mxu1 }
0x1783   :  { %v2064_v12 = vpop.f32.mrf.mxu3 }
0x1784   :  { %v2067_v13 = vadd.f32 %v2064_v12, %v1198_v10  ;;  %v2326_v10 = vld [vmem:[#allocation3 + $0x2a8] sm:$0xff]  ;;  %v3662_v12 = vld [vmem:[%s3763_s5 + $0x18] sm:$0xff] }
0x1786   :  { %2916 = vtanh.f32 %v2067_v13  ;;  %v3668_v13 = vld [vmem:[%s3763_s5 + $0x10] sm:$0xff] }
0x178c   :  { %v2917_v14 = vpop.eup %2916 }
0x178d   :  { %2797 = vmatmul.msk.f32.vlgmr.msrb.gmra.mxu1 %vm279_vm2, %v2917_v14  ;;  %2798 = vmatmul.msk.f32.vlgmr.msrb.gmra.mxu3 %vm279_vm2, %v2917_v14  ;;  %v3674_v14 = vld [vmem:[%s3763_s5 + $0x8] sm:$0xff] }
0x178e   :  { %2212 = vmatpush.msrb.mxu1 %v3412_v58  ;;  %2242 = vmatpush.msrb.mxu3 %v2226_v43  ;;  %v2428_v43 = vld [vmem:[#allocation3 + $0x2e8] sm:$0xff] }
0x1790   :  { %2213 = vmatpush.msrb.mxu1 %v3417_v59  ;;  %2243 = vmatpush.msrb.mxu3 %v2225_v44  ;;  %v2427_v44 = vld [vmem:[#allocation3 + $0x2e0] sm:$0xff] }
0x1792   :  { %2214 = vmatpush.msrb.mxu1 %v3429_v62  ;;  %2244 = vmatpush.msrb.mxu3 %v2224_v45 }
0x1794   :  { %2215 = vmatpush.msrb.mxu1 %v3437_v63  ;;  %2245 = vmatpush.msrb.mxu3 %v2223_v46  ;;  %v1218_v46 = vpop.f32.mrf.mxu2 }
0x1795   :  { %v1219_v50 = vadd.f32 %v3466_v5, %v1218_v46 }
0x180a   :  { %v3642_v48 = vpop.f32.mrf.mxu1 }
0x1810   :  { %v2115_v22 = vpop.f32.mrf.mxu3 }
0x1811   :  { %v2118_v23 = vadd.f32 %v2115_v22, %v1201_v9  ;;  %v2378_v9 = vld [vmem:[#allocation3 + $0x2d0] sm:$0xff]  ;;  %v2377_v22 = vld [vmem:[#allocation3 + $0x2c8] sm:$0xff] }
0x1813   :  { %2918 = vtanh.f32 %v2118_v23  ;;  %v2376_v23 = vld [vmem:[#allocation3 + $0x2c0] sm:$0xff] }
0x1819   :  { %v2919_v24 = vpop.eup %2918 }
0x181a   :  { %2799 = vmatmul.msk.f32.vlgmr.msra.gmra.mxu1 %vm279_vm2, %v2919_v24  ;;  %2800 = vmatmul.msk.f32.vlgmr.msra.gmra.mxu3 %vm279_vm2, %v2919_v24 }
0x181b   :  { %2314 = vmatpush.msra.mxu3 %v3412_v58  ;;  %2293 = vmatpush.msra.mxu1 %v2277_v54  ;;  %v2480_v54 = vld [vmem:[#allocation3 + $0x310] sm:$0xff] }
0x181d   :  { %2315 = vmatpush.msra.mxu3 %v3417_v59  ;;  %2294 = vmatpush.msra.mxu1 %v2276_v56  ;;  %v2479_v56 = vld [vmem:[#allocation3 + $0x308] sm:$0xff] }
0x181f   :  { %2316 = vmatpush.msra.mxu3 %v3429_v62  ;;  %2295 = vmatpush.msra.mxu1 %v2275_v57  ;;  %v2478_v57 = vld [vmem:[#allocation3 + $0x300] sm:$0xff] }
0x1821   :  { %2317 = vmatpush.msra.mxu3 %v3437_v63  ;;  %2296 = vmatpush.msra.mxu1 %v2274_v60  ;;  %v1221_v60 = vpop.f32.mrf.mxu2 }
0x1897   :  { %v3645_v49 = vpop.f32.mrf.mxu1 }
0x189d   :  { %v2166_v27 = vpop.f32.mrf.mxu3 }
0x189e   :  { %v2169_v28 = vadd.f32 %v2166_v27, %v1204_v3 }
0x18a0   :  { %2920 = vtanh.f32 %v2169_v28  ;;  %v2430_v28 = vld [vmem:[#allocation3 + $0x2f8] sm:$0xff] }
0x18a6   :  { %v2921_v30 = vpop.eup %2920 }
0x18a7   :  { %2801 = vmatmul.msk.f32.vlgmr.msrb.gmra.mxu0 %vm279_vm2, %v2921_v30  ;;  %2802 = vmatmul.msk.f32.vlgmr.msrb.gmra.mxu1 %vm279_vm2, %v2921_v30  ;;  %v2429_v30 = vld [vmem:[#allocation3 + $0x2f0] sm:$0xff] }
0x18a8   :  { %2365 = vmatpush.msrb.mxu1 %v3412_v58  ;;  %v2328_v58 = vld [vmem:[#allocation3 + $0x2b8] sm:$0xff] }
0x18a9   :  { %2344 = vmatpush.msrb.mxu0 %v2328_v58  ;;  %v2532_v58 = vld [vmem:[#allocation3 + $0x338] sm:$0xff] }
0x18aa   :  { %2366 = vmatpush.msrb.mxu1 %v3417_v59  ;;  %v2327_v59 = vld [vmem:[#allocation3 + $0x2b0] sm:$0xff] }
0x18ab   :  { %2345 = vmatpush.msrb.mxu0 %v2327_v59  ;;  %v2531_v59 = vld [vmem:[#allocation3 + $0x330] sm:$0xff] }
0x18ac   :  { %2367 = vmatpush.msrb.mxu1 %v3429_v62  ;;  %v2325_v62 = vld [vmem:[#allocation3 + $0x2a0] sm:$0xff] }
0x18ad   :  { %2346 = vmatpush.msrb.mxu0 %v2326_v10  ;;  %v2530_v10 = vld [vmem:[#allocation3 + $0x328] sm:$0xff] }
0x18ae   :  { %2368 = vmatpush.msrb.mxu1 %v3437_v63 }
0x18af   :  { %2347 = vmatpush.msrb.mxu0 %v2325_v62  ;;  %v2529_v62 = vld [vmem:[#allocation3 + $0x320] sm:$0xff] }
0x1924   :  { %v2217_v11 = vpop.f32.mrf.mxu1  ;;  %v3654_v61 = vpop.f32.mrf.mxu0 }
0x1925   :  { %v2220_v52 = vadd.f32 %v2217_v11, %v1207_v51 }
0x1927   :  { %2922 = vtanh.f32 %v2220_v52 }
0x192d   :  { %v2923_v53 = vpop.eup %2922 }
0x192e   :  { %2803 = vmatmul.msk.f32.vlgmr.msrb.gmra.mxu3 %vm279_vm2, %v2923_v53  ;;  %2804 = vmatmul.msk.f32.vlgmr.msra.gmra.mxu0 %vm279_vm2, %v2923_v53  ;;  %v2481_v53 = vld [vmem:[#allocation3 + $0x318] sm:$0xff] }
0x192f   :  { %2416 = vmatpush.msra.mxu0 %v3662_v12  ;;  %2395 = vmatpush.msrb.mxu3 %v2379_v21 }
0x1931   :  { %2417 = vmatpush.msra.mxu0 %v3668_v13  ;;  %2396 = vmatpush.msrb.mxu3 %v2378_v9  ;;  %v2583_v9 = vld [vmem:[#allocation3 + $0x358] sm:$0xff] }
0x1933   :  { %2418 = vmatpush.msra.mxu0 %v3674_v14  ;;  %2397 = vmatpush.msrb.mxu3 %v2377_v22 }
0x1935   :  { %2419 = vmatpush.msra.mxu0 %v3437_v63  ;;  %2398 = vmatpush.msrb.mxu3 %v2376_v23  ;;  %v3689_v63 = vld [vmem:[%s3763_s5] sm:$0xff] }
0x19ab   :  { %v2268_v4 = vpop.f32.mrf.mxu0 }
0x19ac   :  { %v2271_v6 = vadd.f32 %v2268_v4, %v1210_v1  ;;  %v1222_v1 = vadd.f32 %v2944_v0, %v1221_v60 }
0x19ae   :  { %2924 = vtanh.f32 %v2271_v6 }
0x19b1   :  { %v3678_v15 = vpop.f32.mrf.mxu3 }
0x19b4   :  { %v2925_v8 = vpop.eup %2924 }
0x19b5   :  { %2805 = vmatmul.msk.f32.vlgmr.msra.gmra.mxu1 %vm279_vm2, %v2925_v8  ;;  %2806 = vmatmul.msk.f32.vlgmr.msra.gmra.mxu3 %vm279_vm2, %v2925_v8 }
0x19b6   :  { %2467 = vmatpush.msra.mxu3 %v3662_v12  ;;  %2446 = vmatpush.msra.mxu1 %v2430_v28  ;;  %v2632_v28 = vld [vmem:[#allocation3 + $0x368] sm:$0xff] }
0x19b8   :  { %2468 = vmatpush.msra.mxu3 %v3668_v13  ;;  %2447 = vmatpush.msra.mxu1 %v2429_v30  ;;  %v2631_v30 = vld [vmem:[#allocation3 + $0x360] sm:$0xff] }
0x19ba   :  { %2469 = vmatpush.msra.mxu3 %v3674_v14  ;;  %2448 = vmatpush.msra.mxu1 %v2428_v43 }
0x19bc   :  { %2470 = vmatpush.msra.mxu3 %v3689_v63  ;;  %2449 = vmatpush.msra.mxu1 %v2427_v44 }
0x1a32   :  { %v3692_v24 = vpop.f32.mrf.mxu1 }
0x1a38   :  { %v2319_v18 = vpop.f32.mrf.mxu3 }
0x1a39   :  { %v2322_v19 = vadd.f32 %v2319_v18, %v1213_v17  ;;  %v1224_v17 = vpop.f32.mrf.mxu2 }
0x1a3a   :  { %v1225_v18 = vadd.f32 %v2944_v0, %v1224_v17 }
0x1a3b   :  { %2926 = vtanh.f32 %v2322_v19 }
0x1a41   :  { %v2927_v20 = vpop.eup %2926  ;;  %v1227_v23 = vpop.f32.mrf.mxu2 }
0x1a42   :  { %2807 = vmatmul.msk.f32.vlgmr.msrb.gmra.mxu0 %vm279_vm2, %v2927_v20  ;;  %2808 = vmatmul.msk.f32.vlgmr.msrb.gmra.mxu1 %vm279_vm2, %v2927_v20 }
0x1a43   :  { %2518 = vmatpush.msrb.mxu1 %v3662_v12  ;;  %2497 = vmatpush.msrb.mxu0 %v2481_v53 }
0x1a45   :  { %2519 = vmatpush.msrb.mxu1 %v3668_v13  ;;  %2498 = vmatpush.msrb.mxu0 %v2480_v54 }
0x1a47   :  { %2520 = vmatpush.msrb.mxu1 %v3674_v14  ;;  %2499 = vmatpush.msrb.mxu0 %v2479_v56 }
0x1a49   :  { %2521 = vmatpush.msrb.mxu1 %v3689_v63  ;;  %2500 = vmatpush.msrb.mxu0 %v2478_v57  ;;  %v1230_v44 = vpop.f32.mrf.mxu2 }
0x1a4a   :  { %v1231_v46 = vadd.f32 %v2944_v0, %v1230_v44 }
0x1abf   :  { %v2370_v2 = vpop.f32.mrf.mxu1  ;;  %v3701_v45 = vpop.f32.mrf.mxu0 }
0x1ac0   :  { %v2373_v3 = vadd.f32 %v2370_v2, %v1216_v26 }
0x1ac2   :  { %2928 = vtanh.f32 %v2373_v3  ;;  %v2634_v3 = vld [vmem:[#allocation3 + $0x378] sm:$0xff] }
0x1ac8   :  { %v2929_v27 = vpop.eup %2928 }
0x1ac9   :  { %2809 = vmatmul.msk.f32.vlgmr.msrb.gmra.mxu3 %vm279_vm2, %v2929_v27  ;;  %2810 = vmatmul.msk.f32.vlgmr.msra.gmra.mxu0 %vm279_vm2, %v2929_v27  ;;  %v2633_v27 = vld [vmem:[#allocation3 + $0x370] sm:$0xff] }
0x1aca   :  { %2569 = vmatpush.msra.mxu0 %v3662_v12  ;;  %2548 = vmatpush.msrb.mxu3 %v2532_v58 }
0x1acc   :  { %2570 = vmatpush.msra.mxu0 %v3668_v13  ;;  %2549 = vmatpush.msrb.mxu3 %v2531_v59 }
0x1ace   :  { %2571 = vmatpush.msra.mxu0 %v3674_v14  ;;  %2550 = vmatpush.msrb.mxu3 %v2530_v10 }
0x1ad0   :  { %2572 = vmatpush.msra.mxu0 %v3689_v63  ;;  %2551 = vmatpush.msrb.mxu3 %v2529_v62 }
0x1b46   :  { %v2421_v51 = vpop.f32.mrf.mxu0 }
0x1b47   :  { %v2424_v11 = vadd.f32 %v2421_v51, %v1219_v50 }
0x1b49   :  { %2930 = vtanh.f32 %v2424_v11 }
0x1b4c   :  { %v3710_v5 = vpop.f32.mrf.mxu3 }
0x1b4f   :  { %v2931_v52 = vpop.eup %2930 }
0x1b50   :  { %2811 = vmatmul.msk.f32.vlgmr.msra.gmra.mxu1 %vm279_vm2, %v2931_v52  ;;  %2812 = vmatmul.msk.f32.vlgmr.msra.gmra.mxu3 %vm279_vm2, %v2931_v52  ;;  %v1331_v52 = vadd.f32 %v3607_v7, %v3492_v55 }
0x1b51   :  { %2620 = vmatpush.msra.mxu3 %v3662_v12  ;;  %2599 = vmatpush.msra.mxu1 %v2583_v9  ;;  %v2582_v12 = vld [vmem:[#allocation3 + $0x350] sm:$0xff] }
0x1b52   :  { %v1383_v53 = vadd.f32 %v3609_v29, %v1331_v52 }
0x1b53   :  { %2621 = vmatpush.msra.mxu3 %v3668_v13  ;;  %2600 = vmatpush.msra.mxu1 %v2582_v12  ;;  %v2581_v13 = vld [vmem:[#allocation3 + $0x348] sm:$0xff] }
0x1b54   :  { %v1434_v54 = vadd.f32 %v3613_v31, %v1383_v53 }
0x1b55   :  { %2622 = vmatpush.msra.mxu3 %v3674_v14  ;;  %2601 = vmatpush.msra.mxu1 %v2581_v13  ;;  %v2580_v14 = vld [vmem:[#allocation3 + $0x340] sm:$0xff] }
0x1b56   :  { %v1485_v56 = vadd.f32 %v3615_v32, %v1434_v54 }
0x1b57   :  { %2623 = vmatpush.msra.mxu3 %v3689_v63  ;;  %2602 = vmatpush.msra.mxu1 %v2580_v14  ;;  %v1228_v63 = vadd.f32 %v2944_v0, %v1227_v23 }
0x1b58   :  { %v1536_v57 = vadd.f32 %v3617_v33, %v1485_v56 }
0x1b5a   :  { %v1587_v60 = vadd.f32 %v3619_v34, %v1536_v57 }
0x1b5c   :  { %v1638_v0 = vadd.f32 %v3621_v35, %v1587_v60 }
0x1bcd   :  { %v3721_v16 = vpop.f32.mrf.mxu1 }
0x1bd3   :  { %v2472_v4 = vpop.f32.mrf.mxu3 }
0x1bd4   :  { %v2475_v6 = vadd.f32 %v2472_v4, %v1222_v1  ;;  %v1689_v1 = vadd.f32 %v3623_v36, %v1638_v0 }
0x1bd6   :  { %2932 = vtanh.f32 %v2475_v6  ;;  %v1740_v4 = vadd.f32 %v3625_v37, %v1689_v1 }
0x1bd8   :  { %v1791_v6 = vadd.f32 %v3627_v38, %v1740_v4 }
0x1bda   :  { %v1842_v55 = vadd.f32 %v3629_v39, %v1791_v6 }
0x1bdc   :  { %v2933_v8 = vpop.eup %2932  ;;  %v1893_v7 = vadd.f32 %v3631_v40, %v1842_v55 }
0x1bdd   :  { %2813 = vmatmul.msk.f32.vlgmr.msrb.gmra.mxu0 %vm279_vm2, %v2933_v8  ;;  %2814 = vmatmul.msk.f32.vlgmr.msrb.gmra.mxu1 %vm279_vm2, %v2933_v8 }
0x1bde   :  { %2650 = vmatpush.msrb.mxu0 %v2634_v3  ;;  %v1944_v29 = vadd.f32 %v3633_v41, %v1893_v7 }
0x1be0   :  { %2651 = vmatpush.msrb.mxu0 %v2633_v27  ;;  %v1995_v31 = vadd.f32 %v3635_v42, %v1944_v29 }
0x1be2   :  { %2652 = vmatpush.msrb.mxu0 %v2632_v28  ;;  %v2046_v32 = vadd.f32 %v3637_v47, %v1995_v31 }
0x1be4   :  { %2653 = vmatpush.msrb.mxu0 %v2631_v30  ;;  %v2097_v33 = vadd.f32 %v3642_v48, %v2046_v32  ;;  %v2827_v48 = vld [vmem:[%s3766_s8] ss:$0 sm:$0xff] }
0x1be6   :  { %v2148_v34 = vadd.f32 %v3645_v49, %v2097_v33 }
0x1be8   :  { %v2199_v35 = vadd.f32 %v3654_v61, %v2148_v34 }
0x1bea   :  { %v2250_v36 = vadd.f32 %v3678_v15, %v2199_v35 }
0x1bec   :  { %v2301_v37 = vadd.f32 %v3692_v24, %v2250_v36 }
0x1bee   :  { %v2352_v38 = vadd.f32 %v3701_v45, %v2301_v37 }
0x1bf0   :  { %v2403_v39 = vadd.f32 %v3710_v5, %v2352_v38 }
0x1bf2   :  { %v2454_v40 = vadd.f32 %v3721_v16, %v2403_v39 }
0x1c5a   :  { %v2523_v19 = vpop.f32.mrf.mxu1  ;;  %v2502_v22 = vpop.f32.mrf.mxu0 }
0x1c5b   :  { %v2526_v20 = vadd.f32 %v2523_v19, %v1225_v18  ;;  %v2505_v41 = vadd.f32 %v2502_v22, %v2454_v40 }
0x1c5d   :  { %2934 = vtanh.f32 %v2526_v20 }
0x1c63   :  { %v2935_v21 = vpop.eup %2934 }
0x1c64   :  { %2815 = vmatmul.msk.f32.vlgmr.msrb.gmra.mxu3 %vm279_vm2, %v2935_v21  ;;  %2816 = vmatmul.msk.f32.vlgmr.msra.gmra.mxu0 %vm279_vm2, %v2935_v21 }
0x1ce1   :  { %v2574_v25 = vpop.f32.mrf.mxu0 }
0x1ce2   :  { %v2577_v26 = vadd.f32 %v2574_v25, %v1228_v63 }
0x1ce4   :  { %2936 = vtanh.f32 %v2577_v26 }
0x1ce7   :  { %v2553_v43 = vpop.f32.mrf.mxu3 }
0x1ce8   :  { %v2556_v8 = vadd.f32 %v2553_v43, %v2505_v41 }
0x1cea   :  { %v2937_v2 = vpop.eup %2936 }
0x1ceb   :  { %2817 = vmatmul.msk.f32.vlgmr.msra.gmra.mxu1 %vm279_vm2, %v2937_v2  ;;  %2818 = vmatmul.msk.f32.vlgmr.msra.gmra.mxu3 %vm279_vm2, %v2937_v2 }
0x1d68   :  { %v2604_v42 = vpop.f32.mrf.mxu1 }
0x1d69   :  { %v2607_v47 = vadd.f32 %v2604_v42, %v2556_v8 }
0x1d6e   :  { %v2625_v50 = vpop.f32.mrf.mxu3 }
0x1d6f   :  { %v2628_v51 = vadd.f32 %v2625_v50, %v1231_v46 }
0x1d71   :  { %2938 = vtanh.f32 %v2628_v51 }
0x1d77   :  { %v2939_v11 = vpop.eup %2938 }
0x1d78   :  { %2819 = vmatmul.msk.f32.vlgmr.msrb.gmra.mxu0 %vm279_vm2, %v2939_v11 }
0x1df5   :  { %v2655_v49 = vpop.f32.mrf.mxu0 }
0x1df6   :  { %v2658_v61 = vadd.f32 %v2655_v49, %v2607_v47 }
0x1df8   :  { %v2662_v15 = vadd.f32 %v2827_v48, %v2658_v61 }
0x1dfa   :  { %2663 = vst [vmem:[#allocation6] sm:$0xff] %v2662_v15 }
0x1dfb   :  { %2674 = dma.vmem_to_hbm [thread:$0]  %s2670_s17, 128, %s2672_s19, [#allocation5]  }
0x1dfc   :  { %2995 = dma.done.wait [#allocation5], 128  }
0x1dfd   :  { %2996 = vsyncadd [#allocation5], 4294967168 }
0x1dfe   :  { %2679 = vsyncpa [#allocation4], 1 }
0x1dff   :  { %2680 = vsyncpa [#allocation5], 1 }

</bundles_post_ra>
